<compile_context>
chip_gen: v5e
topology: v5e:2x2
jax: 0.10.0
libtpu: 0.0.40
codegen_flags: <defaults>
</compile_context>

<pallas_src>
import functools
import math

import jax
import jax.numpy as jnp
import numpy as np
from jax.experimental import pallas as pl
from jax.experimental.pallas import tpu as pltpu

EPS = 1e-6


def _encoder_kernel(
    x_ref, y_ref,
    a1_ref, c1_ref,                       # Norm1 alpha, bias            (1, D)
    wq_ref, bq_ref,                       # Q projection (scale folded)  (D, D), (1, D)
    wkv_ref, bkv_ref,                     # fused K|V projection         (D, 2D), (1, 2D)
    wo_ref, bo_ref,                       # output projection            (D, D), (1, D)
    a2_ref, c2_ref,                       # Norm2 alpha, bias            (1, D)
    wf1_ref, bf1_ref, wf2_ref, bf2_ref,   # pointwise-conv FF weights
    out_ref,
    kh_s, vh_s,                           # scratch: per-batch K/V heads (H, Sy, dk) bf16
    *, heads: int,
):
    Tx = x_ref.shape[1]
    D = x_ref.shape[2]
    Sy = y_ref.shape[1]
    dk = D // heads

    # ---- per-batch K/V projection, cached in VMEM scratch across all Sx tiles ----
    @pl.when(pl.program_id(1) == 0)
    def _():
        y16 = y_ref[0].astype(jnp.bfloat16)                                    # (Sy, D)
        kv = jnp.dot(y16, wkv_ref[...],
                     preferred_element_type=jnp.float32) + bkv_ref[...]        # (Sy, 2D)
        kh_s[...] = (kv[:, :D].reshape(Sy, heads, dk)
                     .transpose(1, 0, 2).astype(jnp.bfloat16))                 # (H, Sy, dk)
        vh_s[...] = (kv[:, D:].reshape(Sy, heads, dk)
                     .transpose(1, 0, 2).astype(jnp.bfloat16))                 # (H, Sy, dk)

    x = x_ref[0].astype(jnp.float32)       # (Tx, D)  current Sx tile

    # Hoist small vectors once (JAX does not CSE broadcast_in_dim).
    a1 = a1_ref[...]
    c1 = c1_ref[...]
    a2 = a2_ref[...]
    c2 = c2_ref[...]
    bq = bq_ref[...]
    bo = bo_ref[...]
    bf1 = bf1_ref[...]
    bf2 = bf2_ref[...]

    def _norm(v, alpha, bias):
        # torch Norm: alpha * (v - mean) / (std_unbiased + eps) + bias
        mu = jnp.mean(v, axis=-1, keepdims=True)
        var = jnp.sum((v - mu) ** 2, axis=-1, keepdims=True) * (1.0 / (D - 1))
        inv = pl.reciprocal(jnp.sqrt(var) + EPS, approx=True)   # EUP slot, ~free
        return alpha * (v - mu) * inv + bias

    # ---- Norm 1 ----
    x2 = _norm(x, a1, c1)

    # ---- Q projection (bf16 MXU operands, f32 accumulation); 1/sqrt(dk) folded into Wq ----
    q = jnp.dot(x2.astype(jnp.bfloat16), wq_ref[...],
                preferred_element_type=jnp.float32) + bq                        # (Tx, D)

    # ---- head-batched attention: (heads, S, dk) layout, batched matmuls ----
    qh = q.reshape(Tx, heads, dk).transpose(1, 0, 2).astype(jnp.bfloat16)       # (H, Tx, dk)
    kh = kh_s[...]                                                              # (H, Sy, dk)
    vh = vh_s[...]                                                              # (H, Sy, dk)

    s = jnp.einsum("hqd,hkd->hqk", qh, kh,
                   preferred_element_type=jnp.float32)                          # (H, Tx, Sy)
    s = s - jnp.max(s, axis=-1, keepdims=True)
    p = jnp.exp(s)
    p = p * pl.reciprocal(jnp.sum(p, axis=-1, keepdims=True), approx=True)

    o = jnp.einsum("hqk,hkd->hqd", p.astype(jnp.bfloat16), vh,
                   preferred_element_type=jnp.float32)                          # (H, Tx, dk)
    concat = o.transpose(1, 0, 2).reshape(Tx, D)                                # (Tx, D)

    attn = jnp.dot(concat.astype(jnp.bfloat16), wo_ref[...],
                   preferred_element_type=jnp.float32) + bo

    # ---- residual quirk of the reference: x = attn + dropout(attn) (eval => 2*attn) ----
    xr = attn + attn

    # ---- Norm 2 ----
    x2b = _norm(xr, a2, c2)

    # ---- ConvFeedForward (kernel_size=1 convs == pointwise linears) ----
    h1 = jnp.maximum(
        jnp.dot(x2b.astype(jnp.bfloat16), wf1_ref[...],
                preferred_element_type=jnp.float32) + bf1, 0.0)
    ff = jnp.dot(h1.astype(jnp.bfloat16), wf2_ref[...],
                 preferred_element_type=jnp.float32) + bf2

    out_ref[0] = (xr + ff).astype(out_ref.dtype)


def simplex_encoder_layer_conv(x, y, params, *, heads, block_sx=None):
    """x: (B, Sx, D), y: (B, Sy, D). Returns (x_out, y)."""
    B, Sx, D = x.shape
    _, Sy, _ = y.shape
    d_ff = params["wf1"].shape[1]
    dk = D // heads

    # Sx tiling: more, smaller grid steps for DMA/compute overlap.
    # (On v7x re-derive the tile for the 64 MiB VMEM budget; 256-512 is a good range.)
    if block_sx is None:
        block_sx = Sx
        for t in (512, 256, 128):
            if Sx % t == 0:
                block_sx = t
                break
    assert Sx % block_sx == 0
    n_sx = Sx // block_sx

    # Pre-cast MXU weights to bf16 (halves weight DMA/VMEM); fuse K|V into one slab;
    # fold the attention score scale 1/sqrt(dk) into Wq / bq (constants, zero runtime cost).
    wdt = jnp.bfloat16
    scale = 1.0 / math.sqrt(dk)
    wq = (params["wq"] * scale).astype(wdt)
    bq = params["bq"] * scale
    wkv = jnp.concatenate([params["wk"], params["wv"]], axis=1).astype(wdt)   # (D, 2D)
    bkv = jnp.concatenate([params["bk"], params["bv"]], axis=1)               # (1, 2D)
    wo = params["wo"].astype(wdt)
    wf1 = params["wf1"].astype(wdt)
    wf2 = params["wf2"].astype(wdt)

    w2d = lambda shp: pl.BlockSpec(shp, lambda b, i: (0, 0))

    in_specs = [
        pl.BlockSpec((1, block_sx, D), lambda b, i: (b, i, 0)),    # x tile
        pl.BlockSpec((1, Sy, D), lambda b, i: (b, 0, 0)),          # y (whole, per batch)
        w2d((1, D)), w2d((1, D)),                                  # norm1 alpha, bias
        w2d((D, D)), w2d((1, D)),                                  # wq, bq (scale folded)
        w2d((D, 2 * D)), w2d((1, 2 * D)),                          # wkv, bkv (fused)
        w2d((D, D)), w2d((1, D)),                                  # wo, bo
        w2d((1, D)), w2d((1, D)),                                  # norm2 alpha, bias
        w2d((D, d_ff)), w2d((1, d_ff)),                            # ff conv1 (folded k=1)
        w2d((d_ff, D)), w2d((1, D)),                               # ff conv2 (folded k=1)
    ]

    kernel = functools.partial(_encoder_kernel, heads=heads)
    x_out = pl.pallas_call(
        kernel,
        out_shape=jax.ShapeDtypeStruct((B, Sx, D), x.dtype),
        grid_spec=pltpu.PrefetchScalarGridSpec(
            num_scalar_prefetch=0,
            grid=(B, n_sx),
            in_specs=in_specs,
            out_specs=pl.BlockSpec((1, block_sx, D), lambda b, i: (b, i, 0)),
            scratch_shapes=[
                pltpu.VMEM((heads, Sy, dk), jnp.bfloat16),   # cached K heads (per batch)
                pltpu.VMEM((heads, Sy, dk), jnp.bfloat16),   # cached V heads (per batch)
            ],
        ),
        # Batch axis megacore-parallel; Sx axis "arbitrary" because the K/V scratch is
        # carried across Sx tiles of the same batch.  For very large D/d_ff on v7x, also
        # set vmem_limit_bytes and single-buffer the constant-index weight specs
        # (pipeline_mode=pl.Buffered(1)).
        compiler_params=pltpu.CompilerParams(
            dimension_semantics=("parallel", "arbitrary")),
    )(
        x, y,
        params["a1"], params["c1"],
        wq, bq,
        wkv, bkv,
        wo, params["bo"],
        params["a2"], params["c2"],
        wf1, params["bf1"],
        wf2, params["bf2"],
    )
    return x_out, y


def _reference(x, y, p, heads):
    """Pure-JAX f32 reference mirroring the PyTorch eval-mode forward."""
    D = x.shape[-1]
    dk = D // heads

    def norm(v, a, c):
        mu = jnp.mean(v, axis=-1, keepdims=True)
        var = jnp.sum((v - mu) ** 2, axis=-1, keepdims=True) / (D - 1)
        return a * (v - mu) / (jnp.sqrt(var) + EPS) + c

    x2 = norm(x, p["a1"], p["c1"])
    q = x2 @ p["wq"] + p["bq"]
    k = y @ p["wk"] + p["bk"]
    v = y @ p["wv"] + p["bv"]
    B, Sx, _ = q.shape
    Sy = k.shape[1]
    qh = q.reshape(B, Sx, heads, dk).transpose(0, 2, 1, 3)
    kh = k.reshape(B, Sy, heads, dk).transpose(0, 2, 1, 3)
    vh = v.reshape(B, Sy, heads, dk).transpose(0, 2, 1, 3)
    s = jnp.einsum("bhqd,bhkd->bhqk", qh, kh) / math.sqrt(dk)
    pdist = jax.nn.softmax(s, axis=-1)
    o = jnp.einsum("bhqk,bhkd->bhqd", pdist, vh).transpose(0, 2, 1, 3).reshape(B, Sx, D)
    attn = o @ p["wo"] + p["bo"]
    xr = attn + attn
    x2b = norm(xr, p["a2"], p["c2"])
    ff = jnp.maximum(x2b @ p["wf1"] + p["bf1"], 0.0) @ p["wf2"] + p["bf2"]
    return xr + ff, y


def _init_params(key, d_model, d_ff):
    ks = jax.random.split(key, 12)
    s = 0.02
    n = lambda k, shp: (s * jax.random.normal(k, shp)).astype(jnp.float32)
    return {
        "a1": jnp.ones((1, d_model), jnp.float32),
        "c1": jnp.zeros((1, d_model), jnp.float32),
        "wq": n(ks[0], (d_model, d_model)), "bq": n(ks[1], (1, d_model)),
        "wk": n(ks[2], (d_model, d_model)), "bk": n(ks[3], (1, d_model)),
        "wv": n(ks[4], (d_model, d_model)), "bv": n(ks[5], (1, d_model)),
        "wo": n(ks[6], (d_model, d_model)), "bo": n(ks[7], (1, d_model)),
        "a2": jnp.ones((1, d_model), jnp.float32),
        "c2": jnp.zeros((1, d_model), jnp.float32),
        # Conv1d(d_model, d_ff, 1) weight (d_ff, d_model, 1) folded -> (d_model, d_ff)
        "wf1": n(ks[8], (d_model, d_ff)), "bf1": n(ks[9], (1, d_ff)),
        # Conv1d(d_ff, d_model, 1) weight (d_model, d_ff, 1) folded -> (d_ff, d_model)
        "wf2": n(ks[10], (d_ff, d_model)), "bf2": n(ks[11], (1, d_model)),
    }


if __name__ == "__main__":
    B, Sx, Sy = 2, 8, 8
    d_model, d_ff, heads = 32, 64, 4

    key = jax.random.PRNGKey(0)
    kx, ky, kp = jax.random.split(key, 3)
    x = jax.random.normal(kx, (B, Sx, d_model), jnp.float32)
    y = jax.random.normal(ky, (B, Sy, d_model), jnp.float32)
    params = _init_params(kp, d_model, d_ff)

    # TODO(synk): nn.Dropout is implemented as eval-mode identity (matches module.eval()).
    x_out, y_out = simplex_encoder_layer_conv(x, y, params, heads=heads)
    jax.block_until_ready(x_out)

    x_ref, _ = _reference(x, y, params, heads)
    # bf16 MXU operands => looser tolerance than a pure-f32 kernel.
    np.testing.assert_allclose(np.asarray(x_out), np.asarray(x_ref), rtol=2e-2, atol=2e-2)
    np.testing.assert_allclose(np.asarray(y_out), np.asarray(y), rtol=0, atol=0)

    print("KERNEL_OK")
</pallas_src>

<mosaic_0001>
module attributes {stable_mosaic.version = 11 : i64} {
  func.func @_encoder_kernel(%arg0: i32, %arg1: i32, %arg2: memref<1x8x32xf32, #tpu.memory_space<vmem>>, %arg3: memref<1x8x32xf32, #tpu.memory_space<vmem>>, %arg4: memref<1x32xf32, #tpu.memory_space<vmem>>, %arg5: memref<1x32xf32, #tpu.memory_space<vmem>>, %arg6: memref<32x32xbf16, #tpu.memory_space<vmem>>, %arg7: memref<1x32xf32, #tpu.memory_space<vmem>>, %arg8: memref<32x64xbf16, #tpu.memory_space<vmem>>, %arg9: memref<1x64xf32, #tpu.memory_space<vmem>>, %arg10: memref<32x32xbf16, #tpu.memory_space<vmem>>, %arg11: memref<1x32xf32, #tpu.memory_space<vmem>>, %arg12: memref<1x32xf32, #tpu.memory_space<vmem>>, %arg13: memref<1x32xf32, #tpu.memory_space<vmem>>, %arg14: memref<32x64xbf16, #tpu.memory_space<vmem>>, %arg15: memref<1x64xf32, #tpu.memory_space<vmem>>, %arg16: memref<64x32xbf16, #tpu.memory_space<vmem>>, %arg17: memref<1x32xf32, #tpu.memory_space<vmem>>, %arg18: memref<1x8x32xf32, #tpu.memory_space<vmem>>, %arg19: memref<4x8x8xbf16, #tpu.memory_space<vmem>>, %arg20: memref<4x8x8xbf16, #tpu.memory_space<vmem>>) attributes {dimension_semantics = [#tpu.dimension_semantics<parallel>, #tpu.dimension_semantics<arbitrary>], iteration_bounds = array<i64: 2, 1>, scalar_prefetch = 0 : i64, scratch_operands = 2 : i64, tpu.core_type = #tpu.core_type<tc>, window_params = [{transform_indices = @transform_0, window_bounds = array<i64: 1, 8, 32>}, {transform_indices = @transform_1, window_bounds = array<i64: 1, 8, 32>}, {pipeline_mode = #tpu.pipeline_mode<synchronous>, transform_indices = @transform_2, window_bounds = array<i64: 1, 32>}, {pipeline_mode = #tpu.pipeline_mode<synchronous>, transform_indices = @transform_3, window_bounds = array<i64: 1, 32>}, {pipeline_mode = #tpu.pipeline_mode<synchronous>, transform_indices = @transform_4, window_bounds = array<i64: 32, 32>}, {pipeline_mode = #tpu.pipeline_mode<synchronous>, transform_indices = @transform_5, window_bounds = array<i64: 1, 32>}, {pipeline_mode = #tpu.pipeline_mode<synchronous>, transform_indices = @transform_6, window_bounds = array<i64: 32, 64>}, {pipeline_mode = #tpu.pipeline_mode<synchronous>, transform_indices = @transform_7, window_bounds = array<i64: 1, 64>}, {pipeline_mode = #tpu.pipeline_mode<synchronous>, transform_indices = @transform_8, window_bounds = array<i64: 32, 32>}, {pipeline_mode = #tpu.pipeline_mode<synchronous>, transform_indices = @transform_9, window_bounds = array<i64: 1, 32>}, {pipeline_mode = #tpu.pipeline_mode<synchronous>, transform_indices = @transform_10, window_bounds = array<i64: 1, 32>}, {pipeline_mode = #tpu.pipeline_mode<synchronous>, transform_indices = @transform_11, window_bounds = array<i64: 1, 32>}, {pipeline_mode = #tpu.pipeline_mode<synchronous>, transform_indices = @transform_12, window_bounds = array<i64: 32, 64>}, {pipeline_mode = #tpu.pipeline_mode<synchronous>, transform_indices = @transform_13, window_bounds = array<i64: 1, 64>}, {pipeline_mode = #tpu.pipeline_mode<synchronous>, transform_indices = @transform_14, window_bounds = array<i64: 64, 32>}, {pipeline_mode = #tpu.pipeline_mode<synchronous>, transform_indices = @transform_15, window_bounds = array<i64: 1, 32>}, {transform_indices = @transform_16, window_bounds = array<i64: 1, 8, 32>}]} {
    %c0_i32 = arith.constant 0 : i32
    %0 = arith.cmpi eq, %arg1, %c0_i32 : i32
    %1 = arith.extui %0 : i1 to i32
    %c0_i32_0 = arith.constant 0 : i32
    %2 = arith.cmpi ne, %1, %c0_i32_0 : i32
    scf.if %2 {
      %c0_54 = arith.constant 0 : index
      %c0_55 = arith.constant 0 : index
      %c0_56 = arith.constant 0 : index
      %106 = vector.load %arg3[%c0_54, %c0_55, %c0_56] : memref<1x8x32xf32, #tpu.memory_space<vmem>>, vector<1x8x32xf32>
      %107 = vector.shape_cast %106 : vector<1x8x32xf32> to vector<8x32xf32>
      %108 = arith.truncf %107 : vector<8x32xf32> to vector<8x32xbf16>
      %c0_57 = arith.constant 0 : index
      %c0_58 = arith.constant 0 : index
      %109 = vector.load %arg8[%c0_57, %c0_58] : memref<32x64xbf16, #tpu.memory_space<vmem>>, vector<32x64xbf16>
      %cst_59 = arith.constant dense<0.000000e+00> : vector<8x64xf32>
      %110 = tpu.matmul %108, %109, %cst_59 {dimension_numbers = #tpu.dot_dimension_numbers<[1], [0], [0], [1], [0, 0, 1, 1], [], []>} : vector<8x32xbf16>, vector<32x64xbf16>, vector<8x64xf32> -> vector<8x64xf32>
      %c0_60 = arith.constant 0 : index
      %c0_61 = arith.constant 0 : index
      %111 = vector.load %arg9[%c0_60, %c0_61] : memref<1x64xf32, #tpu.memory_space<vmem>>, vector<1x64xf32>
      %112 = vector.broadcast %111 : vector<1x64xf32> to vector<8x64xf32>
      %113 = arith.addf %110, %112 : vector<8x64xf32>
      %114 = vector.extract_strided_slice %113 {offsets = [0, 0], sizes = [8, 32], strides = [1, 1]} : vector<8x64xf32> to vector<8x32xf32>
      %115 = vector.shape_cast %114 : vector<8x32xf32> to vector<8x4x8xf32>
      %116 = tpu.transpose %115, [1, 0, 2] : vector<8x4x8xf32> -> vector<4x8x8xf32>
      %117 = arith.truncf %116 : vector<4x8x8xf32> to vector<4x8x8xbf16>
      %c0_62 = arith.constant 0 : index
      %c0_63 = arith.constant 0 : index
      %c0_64 = arith.constant 0 : index
      %118 = vector.load %arg19[%c0_62, %c0_63, %c0_64] : memref<4x8x8xbf16, #tpu.memory_space<vmem>>, vector<4x8x8xbf16>
      tpu.vector_store %arg19[%c0_62, %c0_63, %c0_64], %117 {strides = array<i32>} : memref<4x8x8xbf16, #tpu.memory_space<vmem>>, vector<4x8x8xbf16>,
      %119 = vector.extract_strided_slice %113 {offsets = [0, 32], sizes = [8, 32], strides = [1, 1]} : vector<8x64xf32> to vector<8x32xf32>
      %120 = vector.shape_cast %119 : vector<8x32xf32> to vector<8x4x8xf32>
      %121 = tpu.transpose %120, [1, 0, 2] : vector<8x4x8xf32> -> vector<4x8x8xf32>
      %122 = arith.truncf %121 : vector<4x8x8xf32> to vector<4x8x8xbf16>
      %c0_65 = arith.constant 0 : index
      %c0_66 = arith.constant 0 : index
      %c0_67 = arith.constant 0 : index
      %123 = vector.load %arg20[%c0_65, %c0_66, %c0_67] : memref<4x8x8xbf16, #tpu.memory_space<vmem>>, vector<4x8x8xbf16>
      tpu.vector_store %arg20[%c0_65, %c0_66, %c0_67], %122 {strides = array<i32>} : memref<4x8x8xbf16, #tpu.memory_space<vmem>>, vector<4x8x8xbf16>,
    } else {
    }
    %c0 = arith.constant 0 : index
    %c0_1 = arith.constant 0 : index
    %c0_2 = arith.constant 0 : index
    %3 = vector.load %arg2[%c0, %c0_1, %c0_2] : memref<1x8x32xf32, #tpu.memory_space<vmem>>, vector<1x8x32xf32>
    %4 = vector.shape_cast %3 : vector<1x8x32xf32> to vector<8x32xf32>
    %c0_3 = arith.constant 0 : index
    %c0_4 = arith.constant 0 : index
    %5 = vector.load %arg4[%c0_3, %c0_4] : memref<1x32xf32, #tpu.memory_space<vmem>>, vector<1x32xf32>
    %c0_5 = arith.constant 0 : index
    %c0_6 = arith.constant 0 : index
    %6 = vector.load %arg5[%c0_5, %c0_6] : memref<1x32xf32, #tpu.memory_space<vmem>>, vector<1x32xf32>
    %c0_7 = arith.constant 0 : index
    %c0_8 = arith.constant 0 : index
    %7 = vector.load %arg12[%c0_7, %c0_8] : memref<1x32xf32, #tpu.memory_space<vmem>>, vector<1x32xf32>
    %c0_9 = arith.constant 0 : index
    %c0_10 = arith.constant 0 : index
    %8 = vector.load %arg13[%c0_9, %c0_10] : memref<1x32xf32, #tpu.memory_space<vmem>>, vector<1x32xf32>
    %c0_11 = arith.constant 0 : index
    %c0_12 = arith.constant 0 : index
    %9 = vector.load %arg7[%c0_11, %c0_12] : memref<1x32xf32, #tpu.memory_space<vmem>>, vector<1x32xf32>
    %c0_13 = arith.constant 0 : index
    %c0_14 = arith.constant 0 : index
    %10 = vector.load %arg11[%c0_13, %c0_14] : memref<1x32xf32, #tpu.memory_space<vmem>>, vector<1x32xf32>
    %c0_15 = arith.constant 0 : index
    %c0_16 = arith.constant 0 : index
    %11 = vector.load %arg15[%c0_15, %c0_16] : memref<1x64xf32, #tpu.memory_space<vmem>>, vector<1x64xf32>
    %c0_17 = arith.constant 0 : index
    %c0_18 = arith.constant 0 : index
    %12 = vector.load %arg17[%c0_17, %c0_18] : memref<1x32xf32, #tpu.memory_space<vmem>>, vector<1x32xf32>
    %cst = arith.constant dense<0.000000e+00> : vector<8xf32>
    %13 = vector.multi_reduction <add>, %4, %cst [1] : vector<8x32xf32> to vector<8xf32>
    %14 = vector.shape_cast %13 : vector<8xf32> to vector<8x1xf32>
    %cst_19 = arith.constant 3.200000e+01 : f32
    %15 = vector.broadcast %cst_19 : f32 to vector<8x1xf32>
    %16 = arith.divf %14, %15 : vector<8x1xf32>
    %17 = vector.broadcast %16 : vector<8x1xf32> to vector<8x32xf32>
    %18 = arith.subf %4, %17 : vector<8x32xf32>
    %19 = arith.mulf %18, %18 : vector<8x32xf32>
    %cst_20 = arith.constant dense<0.000000e+00> : vector<8xf32>
    %20 = vector.multi_reduction <add>, %19, %cst_20 [1] : vector<8x32xf32> to vector<8xf32>
    %21 = vector.shape_cast %20 : vector<8xf32> to vector<8x1xf32>
    %cst_21 = arith.constant 0.0322580636 : f32
    %22 = vector.broadcast %cst_21 : f32 to vector<8x1xf32>
    %23 = arith.mulf %21, %22 : vector<8x1xf32>
    %24 = math.sqrt %23 : vector<8x1xf32>
    %cst_22 = arith.constant 9.99999997E-7 : f32
    %25 = vector.broadcast %cst_22 : f32 to vector<8x1xf32>
    %26 = arith.addf %24, %25 : vector<8x1xf32>
    %27 = tpu.reciprocal %26 {approx = true} : vector<8x1xf32> -> vector<8x1xf32>
    %28 = vector.broadcast %16 : vector<8x1xf32> to vector<8x32xf32>
    %29 = arith.subf %4, %28 : vector<8x32xf32>
    %30 = vector.broadcast %5 : vector<1x32xf32> to vector<8x32xf32>
    %31 = arith.mulf %30, %29 : vector<8x32xf32>
    %32 = vector.broadcast %27 : vector<8x1xf32> to vector<8x32xf32>
    %33 = arith.mulf %31, %32 : vector<8x32xf32>
    %34 = vector.broadcast %6 : vector<1x32xf32> to vector<8x32xf32>
    %35 = arith.addf %33, %34 : vector<8x32xf32>
    %36 = arith.truncf %35 : vector<8x32xf32> to vector<8x32xbf16>
    %c0_23 = arith.constant 0 : index
    %c0_24 = arith.constant 0 : index
    %37 = vector.load %arg6[%c0_23, %c0_24] : memref<32x32xbf16, #tpu.memory_space<vmem>>, vector<32x32xbf16>
    %cst_25 = arith.constant dense<0.000000e+00> : vector<8x32xf32>
    %38 = tpu.matmul %36, %37, %cst_25 {dimension_numbers = #tpu.dot_dimension_numbers<[1], [0], [0], [1], [0, 0, 1, 1], [], []>} : vector<8x32xbf16>, vector<32x32xbf16>, vector<8x32xf32> -> vector<8x32xf32>
    %39 = vector.broadcast %9 : vector<1x32xf32> to vector<8x32xf32>
    %40 = arith.addf %38, %39 : vector<8x32xf32>
    %41 = vector.shape_cast %40 : vector<8x32xf32> to vector<8x4x8xf32>
    %42 = tpu.transpose %41, [1, 0, 2] : vector<8x4x8xf32> -> vector<4x8x8xf32>
    %43 = arith.truncf %42 : vector<4x8x8xf32> to vector<4x8x8xbf16>
    %c0_26 = arith.constant 0 : index
    %c0_27 = arith.constant 0 : index
    %c0_28 = arith.constant 0 : index
    %44 = vector.load %arg19[%c0_26, %c0_27, %c0_28] : memref<4x8x8xbf16, #tpu.memory_space<vmem>>, vector<4x8x8xbf16>
    %c0_29 = arith.constant 0 : index
    %c0_30 = arith.constant 0 : index
    %c0_31 = arith.constant 0 : index
    %45 = vector.load %arg20[%c0_29, %c0_30, %c0_31] : memref<4x8x8xbf16, #tpu.memory_space<vmem>>, vector<4x8x8xbf16>
    "tpu.trace_start"() <{level = 10 : i32, message = "hqd,hkd->hqk"}> : () -> ()
    %cst_32 = arith.constant dense<0.000000e+00> : vector<4x8x8xf32>
    %46 = tpu.matmul %43, %44, %cst_32 {dimension_numbers = #tpu.dot_dimension_numbers<[2], [2], [1], [1], [0, 0, 0, 1, 1, 1], [0], [0]>} : vector<4x8x8xbf16>, vector<4x8x8xbf16>, vector<4x8x8xf32> -> vector<4x8x8xf32>
    "tpu.trace_stop"() : () -> ()
    %cst_33 = arith.constant dense<0xFF800000> : vector<4x8xf32>
    %47 = vector.multi_reduction <maximumf>, %46, %cst_33 [2] : vector<4x8x8xf32> to vector<4x8xf32>
    %48 = vector.shape_cast %47 : vector<4x8xf32> to vector<4x8x1xf32>
    %49 = vector.broadcast %48 : vector<4x8x1xf32> to vector<4x8x8xf32>
    %50 = arith.subf %46, %49 : vector<4x8x8xf32>
    %51 = math.exp %50 : vector<4x8x8xf32>
    %cst_34 = arith.constant dense<0.000000e+00> : vector<4x8xf32>
    %52 = vector.multi_reduction <add>, %51, %cst_34 [2] : vector<4x8x8xf32> to vector<4x8xf32>
    %53 = vector.shape_cast %52 : vector<4x8xf32> to vector<4x8x1xf32>
    %54 = tpu.reciprocal %53 {approx = true} : vector<4x8x1xf32> -> vector<4x8x1xf32>
    %55 = vector.broadcast %54 : vector<4x8x1xf32> to vector<4x8x8xf32>
    %56 = arith.mulf %51, %55 : vector<4x8x8xf32>
    %57 = arith.truncf %56 : vector<4x8x8xf32> to vector<4x8x8xbf16>
    "tpu.trace_start"() <{level = 10 : i32, message = "hqk,hkd->hqd"}> : () -> ()
    %cst_35 = arith.constant dense<0.000000e+00> : vector<4x8x8xf32>
    %58 = tpu.matmul %57, %45, %cst_35 {dimension_numbers = #tpu.dot_dimension_numbers<[2], [1], [1], [2], [0, 0, 0, 1, 1, 2], [0], [0]>} : vector<4x8x8xbf16>, vector<4x8x8xbf16>, vector<4x8x8xf32> -> vector<4x8x8xf32>
    "tpu.trace_stop"() : () -> ()
    %59 = tpu.transpose %58, [1, 0, 2] : vector<4x8x8xf32> -> vector<8x4x8xf32>
    %60 = vector.shape_cast %59 : vector<8x4x8xf32> to vector<8x32xf32>
    %61 = arith.truncf %60 : vector<8x32xf32> to vector<8x32xbf16>
    %c0_36 = arith.constant 0 : index
    %c0_37 = arith.constant 0 : index
    %62 = vector.load %arg10[%c0_36, %c0_37] : memref<32x32xbf16, #tpu.memory_space<vmem>>, vector<32x32xbf16>
    %cst_38 = arith.constant dense<0.000000e+00> : vector<8x32xf32>
    %63 = tpu.matmul %61, %62, %cst_38 {dimension_numbers = #tpu.dot_dimension_numbers<[1], [0], [0], [1], [0, 0, 1, 1], [], []>} : vector<8x32xbf16>, vector<32x32xbf16>, vector<8x32xf32> -> vector<8x32xf32>
    %64 = vector.broadcast %10 : vector<1x32xf32> to vector<8x32xf32>
    %65 = arith.addf %63, %64 : vector<8x32xf32>
    %66 = arith.addf %65, %65 : vector<8x32xf32>
    %cst_39 = arith.constant dense<0.000000e+00> : vector<8xf32>
    %67 = vector.multi_reduction <add>, %66, %cst_39 [1] : vector<8x32xf32> to vector<8xf32>
    %68 = vector.shape_cast %67 : vector<8xf32> to vector<8x1xf32>
    %cst_40 = arith.constant 3.200000e+01 : f32
    %69 = vector.broadcast %cst_40 : f32 to vector<8x1xf32>
    %70 = arith.divf %68, %69 : vector<8x1xf32>
    %71 = vector.broadcast %70 : vector<8x1xf32> to vector<8x32xf32>
    %72 = arith.subf %66, %71 : vector<8x32xf32>
    %73 = arith.mulf %72, %72 : vector<8x32xf32>
    %cst_41 = arith.constant dense<0.000000e+00> : vector<8xf32>
    %74 = vector.multi_reduction <add>, %73, %cst_41 [1] : vector<8x32xf32> to vector<8xf32>
    %75 = vector.shape_cast %74 : vector<8xf32> to vector<8x1xf32>
    %cst_42 = arith.constant 0.0322580636 : f32
    %76 = vector.broadcast %cst_42 : f32 to vector<8x1xf32>
    %77 = arith.mulf %75, %76 : vector<8x1xf32>
    %78 = math.sqrt %77 : vector<8x1xf32>
    %cst_43 = arith.constant 9.99999997E-7 : f32
    %79 = vector.broadcast %cst_43 : f32 to vector<8x1xf32>
    %80 = arith.addf %78, %79 : vector<8x1xf32>
    %81 = tpu.reciprocal %80 {approx = true} : vector<8x1xf32> -> vector<8x1xf32>
    %82 = vector.broadcast %70 : vector<8x1xf32> to vector<8x32xf32>
    %83 = arith.subf %66, %82 : vector<8x32xf32>
    %84 = vector.broadcast %7 : vector<1x32xf32> to vector<8x32xf32>
    %85 = arith.mulf %84, %83 : vector<8x32xf32>
    %86 = vector.broadcast %81 : vector<8x1xf32> to vector<8x32xf32>
    %87 = arith.mulf %85, %86 : vector<8x32xf32>
    %88 = vector.broadcast %8 : vector<1x32xf32> to vector<8x32xf32>
    %89 = arith.addf %87, %88 : vector<8x32xf32>
    %90 = arith.truncf %89 : vector<8x32xf32> to vector<8x32xbf16>
    %c0_44 = arith.constant 0 : index
    %c0_45 = arith.constant 0 : index
    %91 = vector.load %arg14[%c0_44, %c0_45] : memref<32x64xbf16, #tpu.memory_space<vmem>>, vector<32x64xbf16>
    %cst_46 = arith.constant dense<0.000000e+00> : vector<8x64xf32>
    %92 = tpu.matmul %90, %91, %cst_46 {dimension_numbers = #tpu.dot_dimension_numbers<[1], [0], [0], [1], [0, 0, 1, 1], [], []>} : vector<8x32xbf16>, vector<32x64xbf16>, vector<8x64xf32> -> vector<8x64xf32>
    %93 = vector.broadcast %11 : vector<1x64xf32> to vector<8x64xf32>
    %94 = arith.addf %92, %93 : vector<8x64xf32>
    %cst_47 = arith.constant 0.000000e+00 : f32
    %95 = vector.broadcast %cst_47 : f32 to vector<8x64xf32>
    %96 = arith.maximumf %94, %95 : vector<8x64xf32>
    %97 = arith.truncf %96 : vector<8x64xf32> to vector<8x64xbf16>
    %c0_48 = arith.constant 0 : index
    %c0_49 = arith.constant 0 : index
    %98 = vector.load %arg16[%c0_48, %c0_49] : memref<64x32xbf16, #tpu.memory_space<vmem>>, vector<64x32xbf16>
    %cst_50 = arith.constant dense<0.000000e+00> : vector<8x32xf32>
    %99 = tpu.matmul %97, %98, %cst_50 {dimension_numbers = #tpu.dot_dimension_numbers<[1], [0], [0], [1], [0, 0, 1, 1], [], []>} : vector<8x64xbf16>, vector<64x32xbf16>, vector<8x32xf32> -> vector<8x32xf32>
    %100 = vector.broadcast %12 : vector<1x32xf32> to vector<8x32xf32>
    %101 = arith.addf %99, %100 : vector<8x32xf32>
    %102 = arith.addf %66, %101 : vector<8x32xf32>
    %c0_51 = arith.constant 0 : index
    %c0_52 = arith.constant 0 : index
    %c0_53 = arith.constant 0 : index
    %103 = vector.load %arg18[%c0_51, %c0_52, %c0_53] : memref<1x8x32xf32, #tpu.memory_space<vmem>>, vector<1x8x32xf32>
    %104 = vector.shape_cast %103 : vector<1x8x32xf32> to vector<8x32xf32>
    %105 = vector.shape_cast %102 : vector<8x32xf32> to vector<1x8x32xf32>
    tpu.vector_store %arg18[%c0_51, %c0_52, %c0_53], %105 {strides = array<i32>} : memref<1x8x32xf32, #tpu.memory_space<vmem>>, vector<1x8x32xf32>,
    return
  }
  func.func @transform_0(%arg0: i32, %arg1: i32) -> (i32, i32, i32) {
    %c0_i32 = arith.constant 0 : i32
    %c0_i32_0 = arith.constant 0 : i32
    return %arg0, %arg1, %c0_i32 : i32, i32, i32
  }
  func.func @transform_1(%arg0: i32, %arg1: i32) -> (i32, i32, i32) {
    %c0_i32 = arith.constant 0 : i32
    %c0_i32_0 = arith.constant 0 : i32
    %c0_i32_1 = arith.constant 0 : i32
    return %arg0, %c0_i32, %c0_i32_0 : i32, i32, i32
  }
  func.func @transform_2(%arg0: i32, %arg1: i32) -> (i32, i32) {
    %c0_i32 = arith.constant 0 : i32
    %c0_i32_0 = arith.constant 0 : i32
    %c0_i32_1 = arith.constant 0 : i32
    return %c0_i32, %c0_i32_0 : i32, i32
  }
  func.func @transform_3(%arg0: i32, %arg1: i32) -> (i32, i32) {
    %c0_i32 = arith.constant 0 : i32
    %c0_i32_0 = arith.constant 0 : i32
    %c0_i32_1 = arith.constant 0 : i32
    return %c0_i32, %c0_i32_0 : i32, i32
  }
  func.func @transform_4(%arg0: i32, %arg1: i32) -> (i32, i32) {
    %c0_i32 = arith.constant 0 : i32
    %c0_i32_0 = arith.constant 0 : i32
    %c0_i32_1 = arith.constant 0 : i32
    return %c0_i32, %c0_i32_0 : i32, i32
  }
  func.func @transform_5(%arg0: i32, %arg1: i32) -> (i32, i32) {
    %c0_i32 = arith.constant 0 : i32
    %c0_i32_0 = arith.constant 0 : i32
    %c0_i32_1 = arith.constant 0 : i32
    return %c0_i32, %c0_i32_0 : i32, i32
  }
  func.func @transform_6(%arg0: i32, %arg1: i32) -> (i32, i32) {
    %c0_i32 = arith.constant 0 : i32
    %c0_i32_0 = arith.constant 0 : i32
    %c0_i32_1 = arith.constant 0 : i32
    return %c0_i32, %c0_i32_0 : i32, i32
  }
  func.func @transform_7(%arg0: i32, %arg1: i32) -> (i32, i32) {
    %c0_i32 = arith.constant 0 : i32
    %c0_i32_0 = arith.constant 0 : i32
    %c0_i32_1 = arith.constant 0 : i32
    return %c0_i32, %c0_i32_0 : i32, i32
  }
  func.func @transform_8(%arg0: i32, %arg1: i32) -> (i32, i32) {
    %c0_i32 = arith.constant 0 : i32
    %c0_i32_0 = arith.constant 0 : i32
    %c0_i32_1 = arith.constant 0 : i32
    return %c0_i32, %c0_i32_0 : i32, i32
  }
  func.func @transform_9(%arg0: i32, %arg1: i32) -> (i32, i32) {
    %c0_i32 = arith.constant 0 : i32
    %c0_i32_0 = arith.constant 0 : i32
    %c0_i32_1 = arith.constant 0 : i32
    return %c0_i32, %c0_i32_0 : i32, i32
  }
  func.func @transform_10(%arg0: i32, %arg1: i32) -> (i32, i32) {
    %c0_i32 = arith.constant 0 : i32
    %c0_i32_0 = arith.constant 0 : i32
    %c0_i32_1 = arith.constant 0 : i32
    return %c0_i32, %c0_i32_0 : i32, i32
  }
  func.func @transform_11(%arg0: i32, %arg1: i32) -> (i32, i32) {
    %c0_i32 = arith.constant 0 : i32
    %c0_i32_0 = arith.constant 0 : i32
    %c0_i32_1 = arith.constant 0 : i32
    return %c0_i32, %c0_i32_0 : i32, i32
  }
  func.func @transform_12(%arg0: i32, %arg1: i32) -> (i32, i32) {
    %c0_i32 = arith.constant 0 : i32
    %c0_i32_0 = arith.constant 0 : i32
    %c0_i32_1 = arith.constant 0 : i32
    return %c0_i32, %c0_i32_0 : i32, i32
  }
  func.func @transform_13(%arg0: i32, %arg1: i32) -> (i32, i32) {
    %c0_i32 = arith.constant 0 : i32
    %c0_i32_0 = arith.constant 0 : i32
    %c0_i32_1 = arith.constant 0 : i32
    return %c0_i32, %c0_i32_0 : i32, i32
  }
  func.func @transform_14(%arg0: i32, %arg1: i32) -> (i32, i32) {
    %c0_i32 = arith.constant 0 : i32
    %c0_i32_0 = arith.constant 0 : i32
    %c0_i32_1 = arith.constant 0 : i32
    return %c0_i32, %c0_i32_0 : i32, i32
  }
  func.func @transform_15(%arg0: i32, %arg1: i32) -> (i32, i32) {
    %c0_i32 = arith.constant 0 : i32
    %c0_i32_0 = arith.constant 0 : i32
    %c0_i32_1 = arith.constant 0 : i32
    return %c0_i32, %c0_i32_0 : i32, i32
  }
  func.func @transform_16(%arg0: i32, %arg1: i32) -> (i32, i32, i32) {
    %c0_i32 = arith.constant 0 : i32
    %c0_i32_0 = arith.constant 0 : i32
    return %arg0, %arg1, %c0_i32 : i32, i32, i32
  }
}

</mosaic_0001>

<bundles_post_ra>
// kernel: tpu_custom_call.1
= control target key start
LH: loop header
LB: loop body
LE: loop exit
PB: predicated region body
PF: predicated region fallthrough
CT: control target
= control target key end

     0   :  { %s2713_s0 = inlined_call_operand.vmem [shape: f32[2,8,32], index: 0, kind: input, shape index: {}]   ;;  %s2714_s1 = inlined_call_operand.vmem [shape: f32[2,8,32], index: 1, kind: input, shape index: {}]   ;;  %s2715_s2 = inlined_call_operand.vmem [shape: f32[1,32], index: 2, kind: input, shape index: {}]   ;;  %s2716_s3 = inlined_call_operand.vmem [shape: f32[1,32], index: 3, kind: input, shape index: {}]   ;;  %s2717_s4 = inlined_call_operand.vmem [shape: bf16[32,32], index: 4, kind: input, shape index: {}]   ;;  %s2718_s5 = inlined_call_operand.vmem [shape: f32[1,32], index: 5, kind: input, shape index: {}]   ;;  %s2719_s6 = inlined_call_operand.hbm [shape: bf16[32,64], index: 6, kind: input, shape index: {}]   ;;  %s2720_s7 = inlined_call_operand.vmem [shape: f32[1,64], index: 7, kind: input, shape index: {}]   ;;  %s2721_s8 = inlined_call_operand.hbm [shape: bf16[32,32], index: 8, kind: input, shape index: {}]   ;;  %s2722_s9 = inlined_call_operand.vmem [shape: f32[1,32], index: 9, kind: input, shape index: {}]   ;;  %s2723_s10 = inlined_call_operand.vmem [shape: f32[1,32], index: 10, kind: input, shape index: {}]   ;;  %s2724_s11 = inlined_call_operand.vmem [shape: f32[1,32], index: 11, kind: input, shape index: {}]   ;;  %s2725_s12 = inlined_call_operand.hbm [shape: bf16[32,64], index: 12, kind: input, shape index: {}]   ;;  %s2726_s13 = inlined_call_operand.vmem [shape: f32[1,64], index: 13, kind: input, shape index: {}]   ;;  %s2727_s14 = inlined_call_operand.vmem [shape: bf16[64,32], index: 14, kind: input, shape index: {}]   ;;  %s2728_s15 = inlined_call_operand.vmem [shape: f32[1,32], index: 15, kind: input, shape index: {}]   ;;  %s2729_s16 = inlined_call_operand.hbm [shape: f32[2,8,32], index: 16, kind: output, shape index: {}]  }
   0x1   :  { %2740 = sst [smem:[#allocation22_spill]] %s2713_s0 }
   0x2   :  { %2741 = sst [smem:[#allocation23_spill]] %s2721_s8 }
   0x3   :  { %2742 = sst [smem:[#allocation24_spill]] %s2726_s13 }
   0x4   :  { %2743 = sst [smem:[#allocation25_spill]] %s2728_s15 }
   0x5   :  { %2744 = sst [smem:[#allocation26_spill]] %s2729_s16 }
   0x6   :  { %21 = vsyncpa [#allocation5], 0 }
   0x7   :  { %22 = vsyncpa [#allocation8], 0 }
   0x8   :  { %23 = vsyncpa [#allocation6], 0 }
   0x9   :  { %25 = vsyncpa [#allocation6 + $0x1], 0  ;;  %s2266_s21 = smov 0   ;;  %s2268_s22 = smov 0  }
   0xa   :  { %s2270_s23 = smov 0   ;;  %s2272_s24 = smov 0  }
   0xb   :  { %s2274_s25 = smov 0   ;;  %s2276_s26 = smov 0  }
   0xc LB: > { %2745 = sst [smem:[#allocation14_spill]] %s2144_s21  ;;  %s1754_s27 = sadd.s32 4294967295, %s2164_s26   ;;  %s2164_s26 = sphi %s2276_s26, %s31_s26   ;;  %s2160_s25 = sphi %s2274_s25, %s2770_s25   ;;  %s2156_s24 = sphi %s2272_s24, %s2769_s24   ;;  %s2152_s23 = sphi %s2270_s23, %s2768_s23   ;;  %s2148_s22 = sphi %s2268_s22, %s2772_s22   ;;  %s2144_s21 = sphi %s2266_s21, %s2771_s21  }
   0xd   : > { %2746 = sst [smem:[#allocation15_spill]] %s2152_s23  ;;  %s1755_s28 = sadd.s32 4294967294, %s2164_s26  }
   0xe   : > { %2747 = sst [smem:[#allocation16_spill]] %s2160_s25  ;;  %s43_s29 = sadd.s32 1, %s2160_s25 }
   0xf   : > { %2748 = sst [smem:[#allocation17_spill]] %s2164_s26  ;;  %s400_s30 = sadd.s32 1, %s2152_s23 }
  0x10   : > { %p45_p0 = scmp.ge.s32.totalorder %s43_s29, 2  ;;  %p410_p1 = scmp.ne.s32.totalorder %s2152_s23, %s2148_s22 }
  0x11   : > { %p411_p2 = scmp.eq.s32.totalorder %s1754_s27, 1  ;;  %p416_p3 = scmp.ne.s32.totalorder %s2148_s22, %s2144_s21 }
  0x12   : > { %s2774_s29 = smov (%p45_p0, %s43_s29), 0  ;;  %p417_p5 = scmp.eq.s32.totalorder %s1755_s28, 1 }
  0x13   : > { %2749 = sst [smem:[#allocation18_spill]] %s2774_s29  ;;  %p2306_p4 = por %p411_p2, %p410_p1 }
  0x14   : > { %s395_s17 = ssub.s32 %s2160_s25, %s2774_s29  ;;  %p1756_p6 = scmp.ge.s32.totalorder %s2164_s26, 1 }
  0x15   : > { %s2750_s0 = scalar_select %p2306_p4, 1, 0 }
  0x16   : > { %p398_p7 = scmp.eq.s32.totalorder %s395_s17, 0  ;;  %p2313_p8 = por %p417_p5, %p416_p3 }
  0x17   : > { %2751 = sst [smem:[#allocation19_spill]] %s2750_s0  ;;  %p424_p9 = scmp.lt.s32.totalorder %s2164_s26, 3 }
  0x18   : > { %s2752_s18 = scalar_select %p2313_p8, 1, 0 }
  0x19   : > { %s2319_s19 = scalar_select %p398_p7, %s2152_s23, %s400_s30  }
  0x1a   : > { %2753 = sst [smem:[#allocation20_spill]] %s2752_s18  ;;  %p2321_p10 = pnand %p1756_p6, %p424_p9 }
  0x1b   : > { %2754 = sst [smem:[#allocation21_spill]] %s2319_s19  ;;  %p2325_p11 = scmp.eq.s32.totalorder %s1754_s27, 0 }
  0x1c   : > { %p1859_p12 = pneg %p2321_p10  ;;  %s2757_s8 = sld [smem:[#allocation23_spill]] }
  0x1d   : > { %s2166_s25 = smov [#allocation7]   ;;  %s2167_s19 = smov 64  }
  0x1e   : > { %p2336_p13 = pnand %p2325_p11, %p1859_p12  ;;  %s466_s27 = sshll.u32 %s2166_s25, 4  ;;  %s467_s27 = int_to_ptr.vmem [resolvable:$true] %s466_s27 }
  0x1f   : > { %s2168_s23 = smov 4   ;;  %s447_s28 = sshll.u32 %s2719_s6, 4  ;;  %s448_s28 = int_to_ptr.hbm [resolvable:$true] %s447_s28 }
  0x20   : > { %s2169_s17 = smov [#allocation4]   ;;  %s487_s15 = sshll.u32 %s2725_s12, 4  ;;  %s488_s15 = int_to_ptr.hbm [resolvable:$true] %s487_s15 }
  0x21   : > { %s2170_s25 = smov [#allocation9]  }
  0x22   : > { %s464_s29 = sshll.u32 %s2757_s8, 4  ;;  %s449_s8 = sshll.u32 %s2169_s17, 4  ;;  %s465_s29 = int_to_ptr.hbm [resolvable:$true] %s464_s29  ;;  %s450_s8 = int_to_ptr.vmem [resolvable:$true] %s449_s8 }
  0x23   : > { %1865 = dma.hbm_to_vmem [thread:$0]  (!%p2336_p13), %s465_s29, 256, %s467_s27, [#allocation8], %s2167_s19, %s2167_s19, %s2168_s23  }
  0x24   : > { %1862 = dma.hbm_to_vmem [thread:$0]  (!%p2336_p13), %s448_s28, 256, %s450_s8, [#allocation5], %s2167_s19, %s2167_s19, %s2168_s23  }
  0x25   : > { %s489_s13 = sshll.u32 %s2170_s25, 4  ;;  %531 = sbr.rel (%p2321_p10) target bundleno = 1972 (0x7b4), region = 84  ;;  %s490_s13 = int_to_ptr.vmem [resolvable:$true] %s489_s13 }
  0x26   : > { %1868 = dma.hbm_to_vmem [thread:$0]  (!%p2336_p13), %s488_s15, 256, %s490_s13, [#allocation8], %s2167_s19, %s2167_s19, %s2168_s23  }
  0x2a   : > { %2131 = dma.done.wait (%p2325_p11), [#allocation5], 256  }
  0x2b   : > { %2133 = vsyncadd (%p2325_p11), [#allocation5], 4294967040 }
  0x2c   : > { %2135 = dma.done.wait (%p2325_p11), [#allocation8], 512  }
  0x2d   : > { %2137 = vsyncadd (%p2325_p11), [#allocation8], 4294966784  ;;  %p598_p0 = scmp.lt.s32.totalorder %s2156_s24, 1  ;;  %s2759_s23 = sld [smem:[#allocation22_spill]]  ;;  %vm636_vm0 = vcmask 261120   ;;  %v1834_v1 = vld [vmem:[#allocation4 + $0x8] sm:$0xff] }
  0x2e   : > { %v1833_v3 = vld [vmem:[#allocation4] sm:$0xff]  ;;  %646 = vmatpush.bf16.msra.mxu0 %v1834_v1  ;;  %v2171_v6 = vmov 32.0   ;;  %s2172_s20 = smov 120   ;;  %s2173_s30 = smov 104   ;;  %v1836_v22 = vld [vmem:[%s2717_s4 + $0x8] sm:$0xff]  ;;  %vm664_vm2 = vcmask 1047556  }
  0x2f   : > { %s599_s8 = scalar_select %p598_p0, %s2156_s24, 1  ;;  %1962 = vrcp.f32 %v2171_v6  ;;  %v1954_v18 = vld [vmem:[%s2720_s7] ss:$0 sm:$0xff]  ;;  %992 = vmatpush.bf16.msra.mxu1 %v1836_v22  ;;  %v2175_v28 = vmov 1983009808   ;;  %vm778_vm5 = vcmask 60416  }
  0x30   : > { %s2174_s27 = smov 112   ;;  %v1835_v23 = vld [vmem:[%s2717_s4] sm:$0xff]  ;;  %v669_v29 = vunpack.c.l.s4 %v2175_v28  ;;  %v2176_v44 = vmov 1934713408   ;;  %vm1132_vm6 = vcmask 64512   ;;  %s2177_s0 = smov 96  }
  0x31   : > { %s1766_s13 = sshll.u32 %s599_s8, 3  ;;  %v693_v45 = vunpack.c.l.s4 %v2176_v44  ;;  %vm1260_vm7 = vcmask 1043456   ;;  %s2179_s21 = smov 16   ;;  %vm1457_vm8 = vcmask 130048   ;;  %vm1459_vm9 = vcmask 195584  }
  0x32   : > { %s608_s18 = scalar_lea.vmem %s2714_s1, %s1766_s13  ;;  %647 = vmatpush.bf16.msra.mxu0 %v1833_v3  ;;  %v2403_v35 = vunpack.c.0.s8 %v669_v29  ;;  %s2180_s19 = smov 24   ;;  %vm1604_vm12 = vcmask 523264  }
  0x33   : > { %s604_s26 = scalar_lea.vmem %s2759_s23, %s1766_s13  ;;  %v614_v4 = vld [vmem:[%s608_s18] sm:$0xff]  ;;  %993 = vmatpush.bf16.msra.mxu1 %v1835_v23  ;;  %v2420_v56 = vunpack.c.0.s8 %v693_v45  ;;  %s2178_s18 = smov 8  }
  0x34   : > { %v913_v0 = vld [vmem:[%s604_s26] sm:$0xff]  ;;  %v615_v5 = vpack.c.bf16 %v614_v4, %v614_v4  ;;  %s2761_s25 = sld [smem:[#allocation25_spill]] }
  0x35   : > { %v923_v2 = vsel %vm636_vm0, %v913_v0, 0.0  ;;  %v1963_v7 = vpop.eup %1962  ;;  %s2762_s15 = sld [smem:[#allocation26_spill]] }
  0x36   : > { %924 = vadd.xlane.f32.xlu0 %v923_v2  ;;  %1776 = vmatmul.msk.bf16.vlgmr.msra.gmra.mxu0 %vm636_vm0, %v615_v5  ;;  %v927_v8 = vmul.f32 32.0, %v1963_v7  ;;  %vm931_vm1 = vweird.f32 %v1963_v7  ;;  %v1953_v5 = vld [vmem:[%s2715_s2] ss:$0 sm:$0xff] }
  0x38   : > { %v928_v9 = vsub.f32 1.0, %v927_v8 }
  0x3a   : > { %v929_v10 = vmul.f32 %v1963_v7, %v928_v9 }
  0x3c   : > { %v930_v11 = vadd.f32 %v1963_v7, %v929_v10 }
  0x3e   : > { %v2372_v12 = vsel %vm931_vm1, %v1963_v7, %v930_v11 }
  0xa9   : > { %v925_v13 = vpop.xlane.xlu0 %924 }
  0xaa   : > { %v933_v14 = vmul.f32 %v2372_v12, %v925_v13 }
  0xac   : > { %v2375_v15 = vsub.f32 %v913_v0, %v933_v14 }
  0xae   : > { %v935_v16 = vmul.f32 %v2375_v15, %v2375_v15 }
  0xb0   : > { %v936_v17 = vsel %vm636_vm0, %v935_v16, 0.0  ;;  %v957_v16 = vmul.f32 %v1953_v5, %v2375_v15 }
  0xb1   : > { %937 = vadd.xlane.f32.xlu0 %v936_v17  ;;  %v1955_v17 = vld [vmem:[%s2716_s3] ss:$0 sm:$0xff] }
  0xb3   : > { %v649_v19 = vpop.f32.mrf.mxu0 }
  0xb4   : > { %v2383_v20 = vadd.f32 %v1954_v18, %v649_v19 }
  0xb6   : > { %654 = vrot.lane.b32.xlu1 %v2383_v20, %s2172_s20  ;;  %660 = vrot.lane.b32.xlu2 %v2383_v20, %s2173_s30  ;;  %v666_v41 = vrot.slane %v2383_v20, 4 }
  0xbb   : > { %v651_v21 = vpop.f32.mrf.mxu0 }
  0xbe   : > { %657 = vrot.lane.b32.xlu1 %v2383_v20, %s2174_s27 }
 0x110   : > { %v2397_v26 = vpop.permute.xlu2 %660 }
 0x111   : > { %v676_v31 = vrot.slane %v2397_v26, 4 }
 0x124   : > { %v938_v24 = vpop.xlane.xlu0 %937 }
 0x125   : > { %v939_v25 = vmul.f32 0.032258064, %v938_v24 }
 0x127   : > { %1964 = vrsqrt.f32 %v939_v25  ;;  %vm947_vm3 = vcmp.eq.f32.partialorder %v939_v25, inf  ;;  %v950_v51 = vand.u32 2147483648, %v939_v25  ;;  %vm949_vm4 = vcmp.eq.f32.partialorder %v939_v25, 0.0 }
 0x128   : > { %v2400_v32 = vpop.permute.xlu1 %654 }
 0x129   : > { %v678_v34 = vrot.slane %v2400_v32, 4  ;;  %v677_v37 = vsel %vm664_vm2, %v676_v31, %v2400_v32 }
 0x12a   : > { %v683_v42 = vperm.slane %v677_v37, %v2403_v35 }
 0x12b   : > { %v679_v38 = vsel %vm664_vm2, %v2397_v26, %v678_v34 }
 0x12c   : > { %v687_v39 = vperm.slane %v679_v38, %v2403_v35  ;;  %v688_v53 = vrot.slane %v683_v42, 4 }
 0x12d   : > { %v1965_v27 = vpop.eup %1964 }
 0x12e   : > { %v941_v30 = vmul.f32 %v1965_v27, %v939_v25  ;;  %v700_v47 = vrot.slane %v687_v39, 4 }
 0x130   : > { %v942_v33 = vmul.f32 %v1965_v27, %v941_v30  ;;  %v2412_v46 = vpop.permute.xlu1 %657 }
 0x131   : > { %v663_v49 = vrot.slane %v2412_v46, 4  ;;  %v667_v50 = vsel %vm664_vm2, %v2412_v46, %v666_v41 }
 0x132   : > { %v943_v36 = vmul.f32 0.5, %v942_v33  ;;  %v675_v52 = vperm.slane %v667_v50, %v2403_v35 }
 0x133   : > { %v665_v55 = vsel %vm664_vm2, %v663_v49, %v2383_v20 }
 0x134   : > { %v944_v40 = vsub.f32 1.5, %v943_v36  ;;  %v671_v58 = vperm.slane %v665_v55, %v2403_v35  ;;  %v702_v59 = vrot.slane %v675_v52, 4  ;;  %v701_v60 = vsel %vm664_vm2, %v700_v47, %v675_v52 }
 0x135   : > { %v707_v62 = vperm.slane %v701_v60, %v2420_v56 }
 0x136   : > { %v945_v43 = vmul.f32 %v1965_v27, %v944_v40  ;;  %v690_v63 = vrot.slane %v671_v58, 4  ;;  %v689_v0 = vsel %vm664_vm2, %v688_v53, %v671_v58  ;;  %v703_v1 = vsel %vm664_vm2, %v687_v39, %v702_v59 }
 0x137   : > { %v695_v2 = vperm.slane %v689_v0, %v2420_v56  ;;  %v711_v3 = vperm.slane %v703_v1, %v2420_v56  ;;  %v716_v4 = vrot.slane %v707_v62, 4 }
 0x138   : > { %v946_v48 = vmul.f32 %v945_v43, %v939_v25  ;;  %v691_v6 = vsel %vm664_vm2, %v683_v42, %v690_v63 }
 0x139   : > { %v699_v7 = vperm.slane %v691_v6, %v2420_v56  ;;  %v712_v8 = vrot.slane %v695_v2, 4  ;;  %v718_v9 = vrot.slane %v711_v3, 4  ;;  %v717_v11 = vsel %vm664_vm2, 0.0, %v716_v4  ;;  %v1956_v6 = vld [vmem:[%s2718_s5] ss:$0 sm:$0xff] }
 0x13a   : > { %v948_v54 = vsel %vm947_vm3, %v939_v25, %v946_v48 }
 0x13b   : > { %v951_v57 = vsel %vm949_vm4, %v950_v51, %v948_v54  ;;  %v714_v10 = vrot.slane %v699_v7, 4  ;;  %v719_v13 = vsel %vm664_vm2, 0.0, %v718_v9  ;;  %v731_v14 = vsel %vm664_vm2, %v718_v9, %v707_v62 }
 0x13c   : > { %v952_v61 = vadd.f32 1e-06, %v951_v57  ;;  %v735_v18 = vperm.slane %v731_v14, %v2403_v35  ;;  %v736_v19 = vrot.slane %v719_v13, 4  ;;  %v713_v22 = vsel %vm664_vm2, 0.0, %v712_v8 }
 0x13d   : > { %v715_v23 = vsel %vm664_vm2, 0.0, %v714_v10  ;;  %v720_v24 = vsel %vm664_vm2, %v714_v10, %v695_v2 }
 0x13e   : > { %1966 = vrcp.f32 %v952_v61  ;;  %v724_v27 = vperm.slane %v720_v24, %v2403_v35  ;;  %v725_v28 = vrot.slane %v715_v23, 4  ;;  %v737_v15 = vsel %vm664_vm2, %v736_v19, %v717_v11 }
 0x13f   : > { %v741_v29 = vperm.slane %v737_v15, %v2403_v35  ;;  %v756_v30 = vrot.slane %v735_v18, 4 }
 0x140   : > { %v726_v33 = vsel %vm664_vm2, %v725_v28, %v713_v22  ;;  %v744_v34 = vrot.slane %v724_v27, 4 }
 0x141   : > { %v730_v36 = vperm.slane %v726_v33, %v2403_v35  ;;  %v754_v37 = vrot.slane %v741_v29, 4  ;;  %v757_v38 = vsel %vm664_vm2, %v741_v29, %v756_v30 }
 0x142   : > { %v765_v40 = vperm.slane %v757_v38, %v2420_v56 }
 0x143   : > { %v742_v41 = vrot.slane %v730_v36, 4  ;;  %v745_v42 = vsel %vm664_vm2, %v730_v36, %v744_v34  ;;  %v755_v43 = vsel %vm664_vm2, %v754_v37, %v735_v18 }
 0x144   : > { %v1967_v21 = vpop.eup %1966  ;;  %v753_v44 = vperm.slane %v745_v42, %v2420_v56  ;;  %v761_v45 = vperm.slane %v755_v43, %v2420_v56  ;;  %v770_v47 = vrot.slane %v765_v40, 4 }
 0x145   : > { %v958_v25 = vmul.f32 %v1967_v21, %v957_v16  ;;  %v743_v48 = vsel %vm664_vm2, %v742_v41, %v724_v27 }
 0x146   : > { %v749_v49 = vperm.slane %v743_v48, %v2420_v56  ;;  %v772_v50 = vrot.slane %v753_v44, 4  ;;  %v766_v51 = vrot.slane %v761_v45, 4  ;;  %v771_v52 = vsel %vm664_vm2, %v770_v47, %v753_v44 }
 0x147   : > { %v962_v31 = vadd.f32 %v1955_v17, %v958_v25  ;;  %v776_v53 = vpack.c.bf16 %v771_v52, %v771_v52 }
 0x148   : > { %v768_v54 = vrot.slane %v749_v49, 4  ;;  %v767_v55 = vsel %vm664_vm2, %v766_v51, %v749_v49  ;;  %v773_v57 = vsel %vm664_vm2, %v765_v40, %v772_v50 }
 0x149   : > { %v963_v39 = vpack.c.bf16 %v962_v31, %v962_v31  ;;  %v774_v58 = vpack.c.bf16 %v767_v55, %v767_v55  ;;  %v777_v59 = vpack.c.bf16 %v773_v57, %v773_v57  ;;  %781 = vst.msk [vmem:[#allocation2 + $0x8] sm:$0xf] %vm778_vm5, %v776_v53 }
 0x14a   : > { %v769_v60 = vsel %vm664_vm2, %v761_v45, %v768_v54 }
 0x14b   : > { %1785 = vmatmul.msk.bf16.vlgmr.msra.gmra.mxu1 %vm636_vm0, %v963_v39  ;;  %v775_v61 = vpack.c.bf16 %v769_v60, %v769_v60  ;;  %782 = vst.msk [vmem:[#allocation2 + $0xc] sm:$0xf] %vm778_vm5, %v777_v59 }
 0x14c   : > { %779 = vst.msk [vmem:[#allocation2] sm:$0xf] %vm778_vm5, %v774_v58 }
 0x14d   : > { %780 = vst.msk [vmem:[#allocation2 + $0x4] sm:$0xf] %vm778_vm5, %v775_v61 }
 0x150   : > { %v1126_v62 = vld [vmem:[#allocation2 + $0x8] sm:$0xf] }
 0x151   : > { %v1175_v63 = vsel %vm1132_vm6, %v1126_v62, 0 }
 0x152   : > { %1184 = vmatpush.bf16.xpose.msrb.mxu0 %v1175_v63  ;;  %v1127_v0 = vld [vmem:[#allocation2 + $0xc] sm:$0xf] }
 0x153   : > { %v1124_v1 = vld [vmem:[#allocation2] sm:$0xf]  ;;  %v1194_v2 = vsel %vm1132_vm6, %v1127_v0, 0 }
 0x154   : > { %v1137_v3 = vsel %vm1132_vm6, %v1124_v1, 0  ;;  %v1125_v4 = vld [vmem:[#allocation2 + $0x4] sm:$0xf]  ;;  %1203 = vmatpush.bf16.xpose.msrb.mxu1 %v1194_v2 }
 0x155   : > { %1146 = vmatpush.bf16.xpose.msra.mxu2 %v1137_v3  ;;  %v1156_v5 = vsel %vm1132_vm6, %v1125_v4, 0 }
 0x156   : > { %1165 = vmatpush.bf16.xpose.msra.mxu3 %v1156_v5 }
 0x1c8   : > { %v995_v7 = vpop.f32.mrf.mxu1 }
 0x1c9   : > { %v996_v8 = vadd.f32 %v1956_v6, %v995_v7 }
 0x1cb   : > { %1003 = vrot.lane.b32.xlu0 %v996_v8, %s2174_s27  ;;  %1000 = vrot.lane.b32.xlu2 %v996_v8, %s2172_s20  ;;  %v1012_v11 = vrot.slane %v996_v8, 4  ;;  %s595_s20 = sand.u32 1, %s2148_s22   ;;  %s1830_s27 = sshll.u32 %s2156_s24, 3 }
 0x1cc   : > { %1006 = vrot.lane.b32.xlu1 %v996_v8, %s2173_s30  ;;  %s1765_s30 = sshll.u32 %s595_s20, 3  ;;  %s1635_s23 = scalar_lea.hbm %s2762_s15, %s1830_s27 }
 0x1cd   : > { %s597_s26 = scalar_lea.vmem [#allocation10], %s1765_s30  ;;  %s1624_s24 = scalar_lea.sflag [#allocation6], %s595_s20 }
 0x1ce   : > { %s1637_s29 = sshll.u32 %s597_s26, 4  ;;  %s2098_s30 = scalar_lea.hbm %s2762_s15, 16  ;;  %s1638_s29 = int_to_ptr.vmem [resolvable:$true] %s1637_s29 }
 0x1d0   : > { %v997_v9 = vpop.f32.mrf.mxu1 }
 0x225   : > { %v1001_v10 = vpop.permute.xlu2 %1000 }
 0x226   : > { %v1024_v13 = vrot.slane %v1001_v10, 4 }
 0x23d   : > { %v1004_v14 = vpop.permute.xlu0 %1003 }
 0x23e   : > { %v1009_v16 = vrot.slane %v1004_v14, 4  ;;  %v1013_v17 = vsel %vm664_vm2, %v1004_v14, %v1012_v11  ;;  %v1007_v18 = vpop.permute.xlu1 %1006 }
 0x23f   : > { %v1021_v19 = vperm.slane %v1013_v17, %v2403_v35  ;;  %v1022_v21 = vrot.slane %v1007_v18, 4  ;;  %v1025_v22 = vsel %vm664_vm2, %v1007_v18, %v1024_v13 }
 0x240   : > { %v1011_v23 = vsel %vm664_vm2, %v1009_v16, %v996_v8  ;;  %v1033_v24 = vperm.slane %v1025_v22, %v2403_v35 }
 0x241   : > { %v1017_v25 = vperm.slane %v1011_v23, %v2403_v35  ;;  %v1048_v27 = vrot.slane %v1021_v19, 4  ;;  %v1023_v28 = vsel %vm664_vm2, %v1022_v21, %v1001_v10 }
 0x242   : > { %v1029_v15 = vperm.slane %v1023_v28, %v2403_v35  ;;  %v1046_v29 = vrot.slane %v1033_v24, 4 }
 0x243   : > { %v1036_v30 = vrot.slane %v1017_v25, 4  ;;  %v1049_v31 = vsel %vm664_vm2, %v1033_v24, %v1048_v27 }
 0x244   : > { %v1034_v33 = vrot.slane %v1029_v15, 4  ;;  %v1047_v34 = vsel %vm664_vm2, %v1046_v29, %v1021_v19  ;;  %v1057_v36 = vperm.slane %v1049_v31, %v2420_v56 }
 0x245   : > { %v1037_v37 = vsel %vm664_vm2, %v1029_v15, %v1036_v30  ;;  %v1053_v38 = vperm.slane %v1047_v34, %v2420_v56 }
 0x246   : > { %v1035_v39 = vsel %vm664_vm2, %v1034_v33, %v1017_v25  ;;  %v1045_v40 = vperm.slane %v1037_v37, %v2420_v56  ;;  %v1064_v41 = vrot.slane %v1057_v36, 4 }
 0x247   : > { %v1041_v42 = vperm.slane %v1035_v39, %v2420_v56  ;;  %v1062_v43 = vrot.slane %v1053_v38, 4  ;;  %v1943_v39 = vpack.i.bf16 %v2400_v32, %v2383_v20 }
 0x248   : > { %v1060_v44 = vrot.slane %v1045_v40, 4  ;;  %v1065_v45 = vsel %vm664_vm2, 0.0, %v1064_v41  ;;  %v1077_v47 = vsel %vm664_vm2, %v1064_v41, %v1053_v38  ;;  %v1948_v40 = vpack.i.bf16 %v2397_v26, %v2412_v46 }
 0x249   : > { %v1058_v48 = vrot.slane %v1041_v42, 4  ;;  %v1081_v49 = vperm.slane %v1077_v47, %v2403_v35  ;;  %v1082_v50 = vrot.slane %v1065_v45, 4  ;;  %v1063_v52 = vsel %vm664_vm2, 0.0, %v1062_v43 }
 0x24a   : > { %v1061_v51 = vsel %vm664_vm2, 0.0, %v1060_v44  ;;  %v1066_v53 = vsel %vm664_vm2, %v1060_v44, %v1041_v42 }
 0x24b   : > { %v1070_v54 = vperm.slane %v1066_v53, %v2403_v35  ;;  %v1071_v55 = vrot.slane %v1061_v51, 4  ;;  %v1083_v57 = vsel %vm664_vm2, %v1082_v50, %v1063_v52  ;;  %v1059_v58 = vsel %vm664_vm2, 0.0, %v1058_v48 }
 0x24c   : > { %v1087_v59 = vperm.slane %v1083_v57, %v2403_v35  ;;  %v1102_v60 = vrot.slane %v1081_v49, 4 }
 0x24d   : > { %v1072_v61 = vsel %vm664_vm2, %v1071_v55, %v1059_v58  ;;  %v1090_v62 = vrot.slane %v1070_v54, 4 }
 0x24e   : > { %v1076_v63 = vperm.slane %v1072_v61, %v2403_v35  ;;  %v1103_v0 = vsel %vm664_vm2, %v1087_v59, %v1102_v60  ;;  %v1100_v1 = vrot.slane %v1087_v59, 4 }
 0x24f   : > { %v1111_v2 = vperm.slane %v1103_v0, %v2420_v56 }
 0x250   : > { %v1091_v3 = vsel %vm664_vm2, %v1076_v63, %v1090_v62  ;;  %v1088_v4 = vrot.slane %v1076_v63, 4  ;;  %v1101_v5 = vsel %vm664_vm2, %v1100_v1, %v1081_v49 }
 0x251   : > { %v1099_v6 = vperm.slane %v1091_v3, %v2420_v56  ;;  %v1116_v7 = vrot.slane %v1111_v2, 4  ;;  %v1107_v8 = vperm.slane %v1101_v5, %v2420_v56 }
 0x252   : > { %v1089_v9 = vsel %vm664_vm2, %v1088_v4, %v1070_v54 }
 0x253   : > { %v1117_v10 = vsel %vm664_vm2, %v1116_v7, %v1099_v6  ;;  %v1095_v11 = vperm.slane %v1089_v9, %v2420_v56  ;;  %v1112_v13 = vrot.slane %v1107_v8, 4  ;;  %v1118_v14 = vrot.slane %v1099_v6, 4 }
 0x254   : > { %v1122_v16 = vpack.c.bf16 %v1117_v10, %v1117_v10 }
 0x255   : > { %v1113_v17 = vsel %vm664_vm2, %v1112_v13, %v1095_v11  ;;  %v1119_v18 = vsel %vm664_vm2, %v1111_v2, %v1118_v14  ;;  %v1114_v19 = vrot.slane %v1095_v11, 4 }
 0x256   : > { %1788 = vmatmul.msk.bf16.vlgmr.msrb.gmra.mxu0 %vm1132_vm6, %v1122_v16  ;;  %v1120_v21 = vpack.c.bf16 %v1113_v17, %v1113_v17  ;;  %v1123_v22 = vpack.c.bf16 %v1119_v18, %v1119_v18 }
 0x257   : > { %v1115_v23 = vsel %vm664_vm2, %v1107_v8, %v1114_v19 }
 0x258   : > { %1786 = vmatmul.msk.bf16.vlgmr.msra.gmra.mxu2 %vm1132_vm6, %v1120_v21  ;;  %1789 = vmatmul.msk.bf16.vlgmr.msrb.gmra.mxu1 %vm1132_vm6, %v1123_v22  ;;  %v1121_v24 = vpack.c.bf16 %v1115_v23, %v1115_v23 }
 0x25a   : > { %1787 = vmatmul.msk.bf16.vlgmr.msra.gmra.mxu3 %vm1132_vm6, %v1121_v24 }
 0x2d3   : > { %v1186_v25 = vpop.f32.mrf.mxu0 }
 0x2d4   : > { %v1215_v27 = vsel %vm1132_vm6, %v1186_v25, -inf }
 0x2d5   : > { %v1205_v28 = vpop.f32.mrf.mxu1  ;;  %1216 = vmax.xlane.f32.xlu0 %v1215_v27 }
 0x2d6   : > { %v1218_v15 = vsel %vm1132_vm6, %v1205_v28, -inf }
 0x2d7   : > { %1219 = vmax.xlane.f32.xlu2 %v1218_v15 }
 0x2db   : > { %v1148_v29 = vpop.f32.mrf.mxu2  ;;  %v1188_v30 = vpop.f32.mrf.mxu0 }
 0x2dc   : > { %v1209_v36 = vsel %vm1132_vm6, %v1148_v29, -inf }
 0x2dd   : > { %v1167_v31 = vpop.f32.mrf.mxu3  ;;  %v1207_v33 = vpop.f32.mrf.mxu1 }
 0x2de   : > { %v1212_v34 = vsel %vm1132_vm6, %v1167_v31, -inf }
 0x2df   : > { %1213 = vmax.xlane.f32.xlu1 %v1212_v34  ;;  %1210 = vmax.xlane.f32.xlu2 %v1209_v36 }
 0x2e3   : > { %v1150_v37 = vpop.f32.mrf.mxu2 }
 0x2e5   : > { %v1169_v38 = vpop.f32.mrf.mxu3 }
 0x2f7   : > { %1944 = vrot.lane.b32.xlu2 %v1943_v39, %s2177_s0 }
 0x2f8   : > { %1949 = vrot.lane.b32.xlu1 %v1948_v40, %s2177_s0  ;;  %s1639_s0 = sshll.u32 %s1635_s23, 4  ;;  %s1640_s0 = int_to_ptr.hbm [resolvable:$true] %s1639_s0 }
 0x348   : > { %v1217_v41 = vpop.xlane.xlu0 %1216 }
 0x349   : > { %v1223_v42 = vsub.f32 %v1186_v25, %v1217_v41 }
 0x34a   : > { %v1220_v43 = vpop.xlane.xlu2 %1219 }
 0x34b   : > { %v1229_v44 = vmul.f32 1.442695, %v1223_v42  ;;  %v1224_v45 = vsub.f32 %v1205_v28, %v1220_v43 }
 0x34d   : > { %1968 = vpow2.f32 %v1229_v44  ;;  %v1231_v47 = vmul.f32 1.442695, %v1224_v45 }
 0x34f   : > { %1970 = vpow2.f32 %v1231_v47 }
 0x352   : > { %v1211_v48 = vpop.xlane.xlu2 %1210  ;;  %v1214_v50 = vpop.xlane.xlu1 %1213 }
 0x353   : > { %v2529_v49 = vpop.eup %1968  ;;  %v1221_v51 = vsub.f32 %v1148_v29, %v1211_v48  ;;  %v1222_v46 = vsub.f32 %v1167_v31, %v1214_v50 }
 0x354   : > { %v1239_v20 = vsel %vm1132_vm6, %v2529_v49, 0.0 }
 0x355   : > { %v2533_v26 = vpop.eup %1970  ;;  %v1225_v32 = vmul.f32 1.442695, %v1221_v51  ;;  %1240 = vadd.xlane.f32.xlu2 %v1239_v20  ;;  %v1227_v53 = vmul.f32 1.442695, %v1222_v46 }
 0x356   : > { %v1242_v52 = vsel %vm1132_vm6, %v2533_v26, 0.0 }
 0x357   : > { %1243 = vadd.xlane.f32.xlu1 %v1242_v52  ;;  %1972 = vpow2.f32 %v1225_v32 }
 0x358   : > { %1974 = vpow2.f32 %v1227_v53 }
 0x35a   : > { %v1945_v58 = vpop.permute.xlu2 %1944 }
 0x35b   : > { %v1947_v59 = vunpack.i.h.bf16 %v1945_v58  ;;  %v1946_v60 = vunpack.i.l.bf16 %v1945_v58 }
 0x35d   : > { %v2537_v54 = vpop.eup %1972  ;;  %v809_v63 = vrot.slane %v1947_v59, 4  ;;  %v797_v0 = vrot.slane %v1946_v60, 4 }
 0x35e   : > { %v1233_v55 = vsel %vm1132_vm6, %v2537_v54, 0.0  ;;  %v2541_v57 = vpop.eup %1974 }
 0x35f   : > { %1234 = vadd.xlane.f32.xlu0 %v1233_v55  ;;  %v1236_v61 = vsel %vm1132_vm6, %v2541_v57, 0.0 }
 0x367   : > { %1237 = vadd.xlane.f32.xlu0 %v1236_v61 }
 0x36a   : > { %v1950_v62 = vpop.permute.xlu1 %1949 }
 0x36b   : > { %v1952_v1 = vunpack.i.h.bf16 %v1950_v62  ;;  %v1951_v2 = vunpack.i.l.bf16 %v1950_v62 }
 0x36d   : > { %v807_v3 = vrot.slane %v1952_v1, 4  ;;  %v795_v4 = vrot.slane %v1951_v2, 4  ;;  %v798_v5 = vsel %vm664_vm2, %v1951_v2, %v797_v0  ;;  %v810_v6 = vsel %vm664_vm2, %v1952_v1, %v809_v63 }
 0x36e   : > { %v806_v7 = vperm.slane %v798_v5, %v2403_v35  ;;  %v818_v8 = vperm.slane %v810_v6, %v2403_v35 }
 0x36f   : > { %v796_v9 = vsel %vm664_vm2, %v795_v4, %v1946_v60  ;;  %v808_v10 = vsel %vm664_vm2, %v807_v3, %v1947_v59 }
 0x370   : > { %v802_v11 = vperm.slane %v796_v9, %v2403_v35  ;;  %v814_v13 = vperm.slane %v808_v10, %v2403_v35  ;;  %v831_v14 = vrot.slane %v818_v8, 4  ;;  %v833_v16 = vrot.slane %v806_v7, 4 }
 0x372   : > { %v819_v17 = vrot.slane %v814_v13, 4  ;;  %v821_v18 = vrot.slane %v802_v11, 4  ;;  %v832_v19 = vsel %vm664_vm2, %v831_v14, %v806_v7  ;;  %v834_v21 = vsel %vm664_vm2, %v818_v8, %v833_v16 }
 0x373   : > { %v838_v22 = vperm.slane %v832_v19, %v2420_v56  ;;  %v842_v23 = vperm.slane %v834_v21, %v2420_v56 }
 0x374   : > { %v820_v24 = vsel %vm664_vm2, %v819_v17, %v802_v11  ;;  %v822_v25 = vsel %vm664_vm2, %v814_v13, %v821_v18 }
 0x375   : > { %v826_v27 = vperm.slane %v820_v24, %v2420_v56  ;;  %v830_v28 = vperm.slane %v822_v25, %v2420_v56  ;;  %v847_v15 = vrot.slane %v838_v22, 4  ;;  %v849_v29 = vrot.slane %v842_v23, 4 }
 0x377   : > { %v843_v30 = vrot.slane %v826_v27, 4  ;;  %v845_v31 = vrot.slane %v830_v28, 4  ;;  %v850_v33 = vsel %vm664_vm2, 0.0, %v849_v29  ;;  %v862_v34 = vsel %vm664_vm2, %v849_v29, %v838_v22 }
 0x378   : > { %v867_v36 = vrot.slane %v850_v33, 4  ;;  %v848_v38 = vsel %vm664_vm2, 0.0, %v847_v15  ;;  %v866_v40 = vperm.slane %v862_v34, %v2403_v35 }
 0x379   : > { %v846_v37 = vsel %vm664_vm2, 0.0, %v845_v31  ;;  %v851_v39 = vsel %vm664_vm2, %v845_v31, %v826_v27  ;;  %v844_v44 = vsel %vm664_vm2, 0.0, %v843_v30 }
 0x37a   : > { %v855_v41 = vperm.slane %v851_v39, %v2403_v35  ;;  %v856_v42 = vrot.slane %v846_v37, 4  ;;  %v868_v43 = vsel %vm664_vm2, %v867_v36, %v848_v38  ;;  %v887_v47 = vrot.slane %v866_v40, 4 }
 0x37b   : > { %v872_v45 = vperm.slane %v868_v43, %v2403_v35 }
 0x37c   : > { %v857_v48 = vsel %vm664_vm2, %v856_v42, %v844_v44  ;;  %v875_v50 = vrot.slane %v855_v41, 4 }
 0x37d   : > { %v861_v51 = vperm.slane %v857_v48, %v2403_v35  ;;  %v885_v20 = vrot.slane %v872_v45, 4  ;;  %v888_v32 = vsel %vm664_vm2, %v872_v45, %v887_v47 }
 0x37e   : > { %v896_v46 = vperm.slane %v888_v32, %v2420_v56 }
 0x37f   : > { %v873_v52 = vrot.slane %v861_v51, 4  ;;  %v876_v53 = vsel %vm664_vm2, %v861_v51, %v875_v50  ;;  %v886_v55 = vsel %vm664_vm2, %v885_v20, %v866_v40 }
 0x380   : > { %v884_v58 = vperm.slane %v876_v53, %v2420_v56  ;;  %v892_v59 = vperm.slane %v886_v55, %v2420_v56  ;;  %v901_v60 = vrot.slane %v896_v46, 4 }
 0x381   : > { %v874_v61 = vsel %vm664_vm2, %v873_v52, %v855_v41 }
 0x382   : > { %v880_v62 = vperm.slane %v874_v61, %v2420_v56  ;;  %v897_v63 = vrot.slane %v892_v59, 4  ;;  %v902_v0 = vsel %vm664_vm2, %v901_v60, %v884_v58  ;;  %v903_v1 = vrot.slane %v884_v58, 4 }
 0x383   : > { %v907_v2 = vpack.c.bf16 %v902_v0, %v902_v0 }
 0x384   : > { %v898_v3 = vsel %vm664_vm2, %v897_v63, %v880_v62  ;;  %v899_v4 = vrot.slane %v880_v62, 4  ;;  %v904_v5 = vsel %vm664_vm2, %v896_v46, %v903_v1 }
 0x385   : > { %v905_v6 = vpack.c.bf16 %v898_v3, %v898_v3  ;;  %v908_v7 = vpack.c.bf16 %v904_v5, %v904_v5  ;;  %911 = vst.msk [vmem:[#allocation3 + $0x8] sm:$0xf] %vm778_vm5, %v907_v2 }
 0x386   : > { %v900_v8 = vsel %vm664_vm2, %v892_v59, %v899_v4 }
 0x387   : > { %v906_v9 = vpack.c.bf16 %v900_v8, %v900_v8  ;;  %912 = vst.msk [vmem:[#allocation3 + $0xc] sm:$0xf] %vm778_vm5, %v908_v7 }
 0x388   : > { %909 = vst.msk [vmem:[#allocation3] sm:$0xf] %vm778_vm5, %v905_v6 }
 0x389   : > { %910 = vst.msk [vmem:[#allocation3 + $0x4] sm:$0xf] %vm778_vm5, %v906_v9 }
 0x38c   : > { %v1130_v10 = vld [vmem:[#allocation3 + $0x8] sm:$0xf] }
 0x38d   : > { %v1300_v11 = vsel %vm1260_vm7, %v1130_v10, 0 }
 0x38e   : > { %1309 = vmatpush.bf16.msra.mxu0 %v1300_v11  ;;  %v1131_v13 = vld [vmem:[#allocation3 + $0xc] sm:$0xf] }
 0x38f   : > { %v1128_v14 = vld [vmem:[#allocation3] sm:$0xf]  ;;  %v1319_v16 = vsel %vm1260_vm7, %v1131_v13, 0 }
 0x390   : > { %v1262_v17 = vsel %vm1260_vm7, %v1128_v14, 0  ;;  %1328 = vmatpush.bf16.msra.mxu1 %v1319_v16  ;;  %v1129_v18 = vld [vmem:[#allocation3 + $0x4] sm:$0xf] }
 0x391   : > { %1271 = vmatpush.bf16.msrb.mxu2 %v1262_v17  ;;  %v1281_v19 = vsel %vm1260_vm7, %v1129_v18, 0 }
 0x392   : > { %1290 = vmatpush.bf16.msrb.mxu3 %v1281_v19 }
 0x3c8   : > { %v1241_v21 = vpop.xlane.xlu2 %1240 }
 0x3c9   : > { %1976 = vrcp.f32 %v1241_v21 }
 0x3ca   : > { %v1244_v22 = vpop.xlane.xlu1 %1243 }
 0x3cb   : > { %1978 = vrcp.f32 %v1244_v22 }
 0x3cf   : > { %v1977_v23 = vpop.eup %1976 }
 0x3d0   : > { %v1251_v24 = vmul.f32 %v1977_v23, %v2529_v49 }
 0x3d1   : > { %v1979_v25 = vpop.eup %1978 }
 0x3d2   : > { %v1255_v27 = vpack.c.bf16 %v1251_v24, %v1251_v24  ;;  %v1252_v28 = vmul.f32 %v1979_v25, %v2533_v26  ;;  %v1235_v15 = vpop.xlane.xlu0 %1234 }
 0x3d3   : > { %1980 = vrcp.f32 %v1235_v15 }
 0x3d4   : > { %v1256_v29 = vpack.c.bf16 %v1252_v28, %v1252_v28  ;;  %1792 = vmatmul.msk.bf16.vlgmr.msra.gmra.mxu0 %vm1132_vm6, %v1255_v27 }
 0x3d6   : > { %1793 = vmatmul.msk.bf16.vlgmr.msra.gmra.mxu1 %vm1132_vm6, %v1256_v29 }
 0x3d9   : > { %v1981_v30 = vpop.eup %1980 }
 0x3da   : > { %v1249_v31 = vmul.f32 %v1981_v30, %v2537_v54  ;;  %v1238_v33 = vpop.xlane.xlu0 %1237 }
 0x3db   : > { %1982 = vrcp.f32 %v1238_v33 }
 0x3dc   : > { %v1253_v34 = vpack.c.bf16 %v1249_v31, %v1249_v31 }
 0x3de   : > { %1790 = vmatmul.msk.bf16.vlgmr.msrb.gmra.mxu2 %vm1132_vm6, %v1253_v34 }
 0x3e1   : > { %v1983_v49 = vpop.eup %1982 }
 0x3e2   : > { %v1250_v36 = vmul.f32 %v1983_v49, %v2541_v57 }
 0x3e4   : > { %v1254_v37 = vpack.c.bf16 %v1250_v36, %v1250_v36 }
 0x3e6   : > { %1791 = vmatmul.msk.bf16.vlgmr.msrb.gmra.mxu3 %vm1132_vm6, %v1254_v37 }
 0x451   : > { %v1311_v26 = vpop.f32.mrf.mxu0 }
 0x452   : > { %v1334_v42 = vrot.slane %v1311_v26, 4 }
 0x453   : > { %v1330_v38 = vpop.f32.mrf.mxu1 }
 0x454   : > { %v1346_v47 = vrot.slane %v1330_v38, 4 }
 0x459   : > { %v1313_v39 = vpop.f32.mrf.mxu0 }
 0x45b   : > { %v1332_v40 = vpop.f32.mrf.mxu1 }
 0x461   : > { %v1273_v41 = vpop.f32.mrf.mxu2 }
 0x462   : > { %v1336_v43 = vrot.slane %v1273_v41, 4  ;;  %v1335_v54 = vsel %vm664_vm2, %v1334_v42, %v1273_v41 }
 0x463   : > { %v1341_v45 = vperm.slane %v1335_v54, %v2403_v35 }
 0x464   : > { %v1337_v44 = vsel %vm664_vm2, %v1311_v26, %v1336_v43 }
 0x465   : > { %v1345_v48 = vperm.slane %v1337_v44, %v2403_v35  ;;  %v1360_v32 = vrot.slane %v1341_v45, 4  ;;  %v1838_v44 = vld [vmem:[#allocation7 + $0x8] sm:$0xff] }
 0x466   : > { %1490 = vmatpush.bf16.msra.mxu2 %v1838_v44 }
 0x467   : > { %v1372_v53 = vrot.slane %v1345_v48, 4 }
 0x469   : > { %v1275_v57 = vpop.f32.mrf.mxu2  ;;  %v1292_v50 = vpop.f32.mrf.mxu3 }
 0x46a   : > { %v1347_v51 = vsel %vm664_vm2, %v1346_v47, %v1292_v50  ;;  %v1348_v20 = vrot.slane %v1292_v50, 4 }
 0x46b   : > { %v1353_v46 = vperm.slane %v1347_v51, %v2403_v35 }
 0x46c   : > { %v1349_v52 = vsel %vm664_vm2, %v1330_v38, %v1348_v20 }
 0x46d   : > { %v1357_v55 = vperm.slane %v1349_v52, %v2403_v35  ;;  %v1358_v58 = vrot.slane %v1353_v46, 4  ;;  %v1361_v59 = vsel %vm664_vm2, %v1353_v46, %v1360_v32  ;;  %v1957_v32 = vld [vmem:[%s2722_s9] ss:$0 sm:$0xff] }
 0x46e   : > { %v1369_v60 = vperm.slane %v1361_v59, %v2420_v56 }
 0x46f   : > { %v1359_v61 = vsel %vm664_vm2, %v1358_v58, %v1341_v45  ;;  %v1370_v62 = vrot.slane %v1357_v55, 4  ;;  %v1373_v63 = vsel %vm664_vm2, %v1357_v55, %v1372_v53  ;;  %v1837_v45 = vld [vmem:[#allocation7] sm:$0xff] }
 0x470   : > { %v1365_v0 = vperm.slane %v1359_v61, %v2420_v56  ;;  %v1381_v1 = vperm.slane %v1373_v63, %v2420_v56  ;;  %v1384_v2 = vrot.slane %v1369_v60, 4  ;;  %1491 = vmatpush.bf16.msra.mxu2 %v1837_v45 }
 0x471   : > { %v1371_v3 = vsel %vm664_vm2, %v1370_v62, %v1345_v48  ;;  %v1294_v4 = vpop.f32.mrf.mxu3 }
 0x472   : > { %v1377_v5 = vperm.slane %v1371_v3, %v2420_v56  ;;  %v1382_v6 = vrot.slane %v1365_v0, 4  ;;  %v1385_v7 = vsel %vm664_vm2, 0.0, %v1384_v2  ;;  %v1388_v8 = vrot.slane %v1381_v1, 4  ;;  %v1839_v1 = vld [vmem:[#allocation9] sm:$0xff]  ;;  %v1844_v4 = vld [vmem:[%s2727_s14 + $0x18] sm:$0xff] }
 0x473   : > { %v1395_v9 = vrot.slane %v1385_v7, 4  ;;  %v1390_v14 = vsel %vm664_vm2, %v1384_v2, %v1365_v0  ;;  %v1840_v0 = vld [vmem:[#allocation9 + $0x8] sm:$0xff]  ;;  %1612 = vmatpush.bf16.msrb.mxu0 %v1844_v4 }
 0x474   : > { %v1383_v10 = vsel %vm664_vm2, 0.0, %v1382_v6  ;;  %v1386_v11 = vrot.slane %v1377_v5, 4  ;;  %v1389_v13 = vsel %vm664_vm2, 0.0, %v1388_v8  ;;  %v1401_v18 = vsel %vm664_vm2, %v1388_v8, %v1377_v5  ;;  %1560 = vmatpush.bf16.msra.mxu3 %v1840_v0  ;;  %v1842_v8 = vld [vmem:[%s2727_s14 + $0x8] sm:$0xff] }
 0x475   : > { %v1396_v16 = vsel %vm664_vm2, %v1395_v9, %v1383_v10  ;;  %v1406_v17 = vrot.slane %v1389_v13, 4  ;;  %v1405_v22 = vperm.slane %v1401_v18, %v2403_v35  ;;  %v1394_v24 = vperm.slane %v1390_v14, %v2403_v35 }
 0x476   : > { %v1387_v19 = vsel %vm664_vm2, 0.0, %v1386_v11  ;;  %v1400_v21 = vperm.slane %v1396_v16, %v2403_v35 }
 0x477   : > { %v1407_v23 = vsel %vm664_vm2, %v1406_v17, %v1387_v19  ;;  %v1426_v28 = vrot.slane %v1405_v22, 4  ;;  %v1414_v36 = vrot.slane %v1394_v24, 4  ;;  %v1958_v19 = vld [vmem:[%s2723_s10] ss:$0 sm:$0xff] }
 0x478   : > { %v1411_v25 = vperm.slane %v1407_v23, %v2403_v35  ;;  %v1412_v27 = vrot.slane %v1400_v21, 4  ;;  %1561 = vmatpush.bf16.msra.mxu3 %v1839_v1 }
 0x479   : > { %v1415_v39 = vsel %vm664_vm2, %v1400_v21, %v1414_v36 }
 0x47a   : > { %v1413_v15 = vsel %vm664_vm2, %v1412_v27, %v1394_v24  ;;  %v1424_v29 = vrot.slane %v1411_v25, 4  ;;  %v1427_v33 = vsel %vm664_vm2, %v1411_v25, %v1426_v28  ;;  %v1423_v41 = vperm.slane %v1415_v39, %v2420_v56  ;;  %v1841_v28 = vld [vmem:[%s2727_s14] sm:$0xff] }
 0x47b   : > { %v1419_v30 = vperm.slane %v1413_v15, %v2420_v56  ;;  %v1435_v35 = vperm.slane %v1427_v33, %v2420_v56 }
 0x47c   : > { %v1425_v31 = vsel %vm664_vm2, %v1424_v29, %v1405_v22  ;;  %v1442_v43 = vrot.slane %v1423_v41, 4  ;;  %v1959_v22 = vld [vmem:[%s2724_s11] ss:$0 sm:$0xff] }
 0x47d   : > { %v1431_v34 = vperm.slane %v1425_v31, %v2420_v56  ;;  %v1438_v49 = vrot.slane %v1419_v30, 4  ;;  %v1440_v40 = vrot.slane %v1435_v35, 4 }
 0x47e   : > { %v1443_v54 = vsel %vm664_vm2, %v1435_v35, %v1442_v43 }
 0x47f   : > { %v1436_v37 = vrot.slane %v1431_v34, 4  ;;  %v1439_v26 = vsel %vm664_vm2, %v1431_v34, %v1438_v49  ;;  %v1441_v42 = vsel %vm664_vm2, %v1440_v40, %v1423_v41  ;;  %v1961_v49 = vld [vmem:[%s2761_s25] ss:$0 sm:$0xff] }
 0x480   : > { %1445 = vrot.lane.b32.xlu0 %v1439_v26, %s2178_s18  ;;  %s2092_s18 = sshra.s32 %s1640_s0, 4  ;;  %s2093_s18 = int_to_ptr.hbm [resolvable:$true] %s2092_s18 }
 0x481   : > { %v1437_v38 = vsel %vm664_vm2, %v1436_v37, %v1419_v30  ;;  %p2099_p5 = scmp.lt.s32.totalorder %s2093_s18, %s2762_s15 }
 0x488   : > { %1449 = vrot.lane.b32.xlu0 %v1441_v42, %s2179_s21  ;;  %s2094_s21 = scalar_lea.hbm %s2093_s18, 8 }
 0x489   : > { %p2095_p1 = scmp.ne.s32.totalorder %s2093_s18, %s2094_s21  ;;  %p2100_p6 = scmp.lt.s32.totalorder %s2098_s30, %s2094_s21 }
 0x48b   : > { %p2096_p2 = pnand %p2095_p1, %p2306_p4  ;;  %p2101_p7 = por %p2100_p6, %p2099_p5 }
 0x48d   : > { %p2097_p3 = pneg %p2096_p2 }
 0x48f   : > { %p2102_p9 = pnand %p2101_p7, %p2097_p3 }
 0x490   : > { %1453 = vrot.lane.b32.xlu0 %v1443_v54, %s2180_s19  ;;  %s2760_s19 = sld [smem:[#allocation24_spill]] }
 0x496   : > { %v1960_v15 = vld [vmem:[%s2760_s19] ss:$0 sm:$0xff] }
 0x4f2   : > { %v1446_v47 = vpop.permute.xlu0 %1445 }
 0x4f3   : > { %v1456_v57 = vsel %vm1132_vm6, %v1437_v38, %v1446_v47 }
 0x4fa   : > { %v1450_v48 = vpop.permute.xlu0 %1449 }
 0x4fb   : > { %v1458_v56 = vsel %vm1457_vm8, %v1456_v57, %v1450_v48 }
 0x502   : > { %v1454_v50 = vpop.permute.xlu0 %1453 }
 0x503   : > { %v1460_v51 = vsel %vm1459_vm9, %v1458_v56, %v1454_v50 }
 0x504   : > { %v1461_v20 = vpack.c.bf16 %v1460_v51, %v1460_v51 }
 0x506   : > { %1802 = vmatmul.msk.bf16.vlgmr.msra.gmra.mxu2 %vm636_vm0, %v1461_v20 }
 0x589   : > { %v1493_v46 = vpop.f32.mrf.mxu2 }
 0x58a   : > { %v1494_v52 = vadd.f32 %v1957_v32, %v1493_v46 }
 0x58c   : > { %v2642_v53 = vadd.f32 %v1494_v52, %v1494_v52 }
 0x58e   : > { %v1498_v55 = vsel %vm636_vm0, %v2642_v53, 0.0 }
 0x58f   : > { %1499 = vadd.xlane.f32.xlu0 %v1498_v55 }
 0x591   : > { %v1495_v58 = vpop.f32.mrf.mxu2 }
 0x602   : > { %v1500_v59 = vpop.xlane.xlu0 %1499 }
 0x603   : > { %v1501_v60 = vmul.f32 %v1500_v59, %v2372_v12  ;;  %v1843_v12 = vld [vmem:[%s2727_s14 + $0x10] sm:$0xff] }
 0x604   : > { %1613 = vmatpush.bf16.msrb.mxu0 %v1843_v12 }
 0x605   : > { %v1502_v61 = vsub.f32 %v2642_v53, %v1501_v60 }
 0x607   : > { %v1503_v62 = vmul.f32 %v1502_v61, %v1502_v61  ;;  %v1525_v21 = vmul.f32 %v1958_v19, %v1502_v61 }
 0x608   : > { %1614 = vmatpush.bf16.msrb.mxu0 %v1842_v8 }
 0x609   : > { %v1504_v63 = vsel %vm636_vm0, %v1503_v62, 0.0 }
 0x60a   : > { %1505 = vadd.xlane.f32.xlu2 %v1504_v63 }
 0x60c   : > { %1615 = vmatpush.bf16.msrb.mxu0 %v1841_v28 }
 0x67d   : > { %v1506_v2 = vpop.xlane.xlu2 %1505 }
 0x67e   : > { %v1507_v3 = vmul.f32 0.032258064, %v1506_v2 }
 0x680   : > { %1984 = vrsqrt.f32 %v1507_v3  ;;  %vm1515_vm10 = vcmp.eq.f32.partialorder %v1507_v3, inf  ;;  %v1518_v14 = vand.u32 2147483648, %v1507_v3  ;;  %vm1517_vm11 = vcmp.eq.f32.partialorder %v1507_v3, 0.0 }
 0x686   : > { %v1985_v5 = vpop.eup %1984 }
 0x687   : > { %v1509_v6 = vmul.f32 %v1985_v5, %v1507_v3 }
 0x689   : > { %v1510_v7 = vmul.f32 %v1985_v5, %v1509_v6 }
 0x68b   : > { %v1511_v9 = vmul.f32 0.5, %v1510_v7 }
 0x68d   : > { %v1512_v10 = vsub.f32 1.5, %v1511_v9 }
 0x68f   : > { %v1513_v11 = vmul.f32 %v1985_v5, %v1512_v10 }
 0x691   : > { %v1514_v13 = vmul.f32 %v1513_v11, %v1507_v3 }
 0x693   : > { %v1516_v16 = vsel %vm1515_vm10, %v1507_v3, %v1514_v13 }
 0x694   : > { %v1519_v17 = vsel %vm1517_vm11, %v1518_v14, %v1516_v16 }
 0x695   : > { %v1520_v18 = vadd.f32 1e-06, %v1519_v17 }
 0x697   : > { %1986 = vrcp.f32 %v1520_v18 }
 0x69d   : > { %v1987_v23 = vpop.eup %1986 }
 0x69e   : > { %v1526_v24 = vmul.f32 %v1987_v23, %v1525_v21 }
 0x6a0   : > { %v1530_v25 = vadd.f32 %v1959_v22, %v1526_v24 }
 0x6a2   : > { %v1531_v27 = vpack.c.bf16 %v1530_v25, %v1530_v25 }
 0x6a4   : > { %1811 = vmatmul.msk.bf16.vlgmr.msra.gmra.mxu3 %vm636_vm0, %v1531_v27 }
 0x727   : > { %v1563_v29 = vpop.f32.mrf.mxu3 }
 0x728   : > { %v1564_v30 = vadd.f32 %v1960_v15, %v1563_v29 }
 0x72a   : > { %v1567_v31 = vmax.f32 %v1564_v30, 0.0 }
 0x72c   : > { %v1568_v33 = vpack.c.bf16 %v1567_v31, %v1567_v31 }
 0x72e   : > { %1828 = vmatmul.msk.bf16.vlgmr.msrb.gmra.mxu0 %vm1604_vm12, %v1568_v33 }
 0x72f   : > { %v1565_v34 = vpop.f32.mrf.mxu3 }
 0x7ab   : > { %v1617_v36 = vpop.f32.mrf.mxu0 }
 0x7ac   : > { %v1618_v37 = vadd.f32 %v1961_v49, %v1617_v36 }
 0x7ae   : > { %v1621_v26 = vadd.f32 %v1618_v37, %v2642_v53 }
 0x7b0   : > { %1622 = vst.msk [vmem:[%s597_s26] sm:$0xff] %vm636_vm0, %v1621_v26 }
 0x7b1   : > { %2105 = shalt.err (!%p2102_p9)
}
 0x7b2   : > { %1857 = dma.vmem_to_hbm [thread:$0]  (%p2306_p4), %s1638_s29, 128, %s1640_s0, %s1624_s24  }
 0x7b3   : > { %v1619_v35 = vpop.f32.mrf.mxu0 }
 0x7b4 PF: > { %s2764_s20 = sld [smem:[#allocation17_spill]] }
 0x7b5   : > { %s2765_s25 = sld [smem:[#allocation14_spill]] }
 0x7ba   : > { %p1879_p10 = scmp.ge.s32.totalorder %s2764_s20, 2 }
 0x7bb   : > { %s1651_s13 = sand.u32 1, %s2765_s25  }
 0x7bc   : > { %p1870_p11 = pnand %p1879_p10, %p2313_p8  ;;  %s1652_s23 = scalar_lea.sflag [#allocation6], %s1651_s13 }
 0x7be   : > { %p1871_p12 = pneg %p1870_p11 }
 0x7c0   : > { %2139 = dma.done.wait (%p1871_p12), %s1652_s23, 128  }
 0x7c1   : > { %2141 = vsyncadd (%p1871_p12), %s1652_s23, 4294967168  ;;  %s31_s26 = sadd.s32 1, %s2764_s20   ;;  %s2767_s18 = sld [smem:[#allocation15_spill]] }
 0x7c2   : > { %p28_p13 = scmp.ge.s32.totalorder %s31_s26, 4   ;;  %s2768_s23 = sld [smem:[#allocation21_spill]] }
 0x7c3   : > { %s2769_s24 = sld [smem:[#allocation16_spill]]  ;;  %s2771_s21 = smov %s2148_s22 }
 0x7c4   : > { %s2770_s25 = sld [smem:[#allocation18_spill]]  ;;  %30 = sbr.rel (!%p28_p13) target bundleno = 12 (0xc), region = 139 }
 0x7c7   : > { %s2772_s22 = smov %s2767_s18 }
 0x7c9   :  { %1658 = vsyncpa [#allocation5], 1 }
 0x7ca   :  { %1660 = vsyncpa [#allocation5 + $0x1], 1 }
 0x7cb   :  { %1661 = vsyncpa [#allocation8], 1 }
 0x7cc   :  { %1662 = vsyncpa [#allocation6], 1 }
 0x7cd   :  { %1664 = vsyncpa [#allocation6 + $0x1], 1 }

</bundles_post_ra>
